<compile_context>
chip_gen: v6e
topology: v6e:2x2x1
jax: 0.10.0
libtpu: 0.0.40
codegen_flags: <defaults>
</compile_context>

<pallas_src>
import functools

import jax
import jax.numpy as jnp
from jax.experimental import pallas as pl
from jax.experimental.pallas import tpu as pltpu


def _critic_kernel(x_ref, w1_ref, b1_ref, w2_ref, b2_ref, w3_ref, b3_ref, o_ref):
    # fc1: single K=d_in MXU dot (concat already fused in the wrapper), f32 acc.
    h1 = jnp.dot(x_ref[...], w1_ref[...], preferred_element_type=jnp.float32)
    # bias + ReLU in the bias dtype: bf16 on the fast path (packed VPU work, no
    # extra cast before fc2), f32 on the exact path.
    h1 = jnp.maximum(h1.astype(b1_ref.dtype) + b1_ref[...], 0.0)
    h1 = h1.astype(w2_ref.dtype)

    # fc2: MXU dot with f32 accumulation; epilogue kept in f32.
    h2 = jnp.dot(h1, w2_ref[...], preferred_element_type=jnp.float32)
    h2 = jnp.maximum(h2 + b2_ref[...], 0.0)                       # (TB, H) f32

    # q_out (256 -> 1): VPU multiply + lane reduction against a lane-dense f32
    # (1, H) row instead of a 1-column MXU matmul; b3 is an SMEM scalar.
    q = jnp.sum(h2 * w3_ref[...], axis=-1, keepdims=True) + b3_ref[0]
    o_ref[...] = q.astype(o_ref.dtype)


def prepare_critic_params(params, compute_dtype=jnp.bfloat16):
    """One-time preprocessing (hoisted out of the per-call forward path)."""
    w1, b1, w2, b2, w3, b3 = params
    H = w1.shape[1]
    cdt = compute_dtype
    return (
        w1.astype(cdt),                          # (d_in, H) fused fc1 weight (MXU)
        b1.reshape(1, H).astype(cdt),            # fc1 epilogue dtype == compute dtype
        w2.astype(cdt),                          # (H, H) fc2 weight (MXU)
        b2.reshape(1, H).astype(jnp.float32),    # fc2 epilogue stays f32
        w3.reshape(1, H).astype(jnp.float32),    # lane-dense row, VPU-only -> f32
        b3.reshape(1).astype(jnp.float32),       # SMEM scalar
    )


def _auto_tile_b(batch):
    rup = lambda x, m: -(-x // m) * m
    t = rup(pl.cdiv(batch, 2), 256)   # >=2 grid steps when batch > 256 (v7x megacore)
    t = min(t, 2048)                  # cap rows/tile (step overhead amortized by then)
    t = min(t, rup(batch, 8))         # don't vastly exceed the (8-row padded) batch
    return max(t, 8)


@functools.partial(jax.jit, static_argnames=("tile_b",))
def critic_forward(state, action, prepared_params, tile_b=None):
    """state: (B, dim_state), action: (B, dim_action) -> q_value: (B, 1) float32."""
    w1, b1, w2, b2, w3, b3 = prepared_params
    B = state.shape[0]
    d_in, H = w1.shape
    cdt = w1.dtype

    if tile_b is None:
        tile_b = _auto_tile_b(B)
    num_tiles = pl.cdiv(B, tile_b)

    # Fused "concat": one (B, d_in) operand -> a single K=d_in MXU dot in-kernel.
    x = jnp.concatenate([state, action], axis=1).astype(cdt)

    param_bytes = sum(int(p.size) * p.dtype.itemsize for p in prepared_params)
    cost = pl.CostEstimate(
        flops=2 * B * (d_in * H + H * H + H),
        transcendentals=0,
        bytes_accessed=int(x.size) * x.dtype.itemsize + param_bytes + B * 4,
    )

    return pl.pallas_call(
        _critic_kernel,
        out_shape=jax.ShapeDtypeStruct((B, 1), jnp.float32),
        grid_spec=pltpu.PrefetchScalarGridSpec(
            num_scalar_prefetch=0,
            grid=(num_tiles,),
            in_specs=[
                pl.BlockSpec((tile_b, d_in), lambda i: (i, 0)),      # x tile
                pl.BlockSpec((d_in, H), lambda i: (0, 0)),           # w1 (resident)
                pl.BlockSpec((1, H), lambda i: (0, 0)),              # b1
                pl.BlockSpec((H, H), lambda i: (0, 0)),              # w2 (resident)
                pl.BlockSpec((1, H), lambda i: (0, 0)),              # b2
                pl.BlockSpec((1, H), lambda i: (0, 0)),              # w3 row
                pl.BlockSpec(memory_space=pltpu.MemorySpace.SMEM),   # b3 scalar
            ],
            out_specs=pl.BlockSpec((tile_b, 1), lambda i: (i, 0)),
        ),
        compiler_params=pltpu.CompilerParams(
            dimension_semantics=("parallel",),
            vmem_limit_bytes=(64 * 1024 * 1024) if tile_b >= 4096 else None,
        ),
        cost_estimate=cost,
    )(x, w1, b1, w2, b2, w3, b3)


def init_critic_params(key, dim_state, dim_action, hidden=256):
    """Deterministic init mimicking torch.nn.Linear default (U[-1/sqrt(fan_in), +])."""
    d_in = dim_state + dim_action
    ks = jax.random.split(key, 6)

    def lin(kw, kb, fan_in, fan_out):
        bound = 1.0 / jnp.sqrt(jnp.float32(fan_in))
        w = jax.random.uniform(kw, (fan_in, fan_out), jnp.float32, -bound, bound)
        b = jax.random.uniform(kb, (fan_out,), jnp.float32, -bound, bound)
        return w, b

    w1, b1 = lin(ks[0], ks[1], d_in, hidden)
    w2, b2 = lin(ks[2], ks[3], hidden, hidden)
    w3, b3 = lin(ks[4], ks[5], hidden, 1)
    return (w1, b1, w2, b2, w3, b3)


def critic_reference(state, action, params):
    w1, b1, w2, b2, w3, b3 = params
    x = jnp.concatenate([state, action], axis=1)
    h1 = jnp.maximum(x @ w1 + b1, 0.0)
    h2 = jnp.maximum(h1 @ w2 + b2, 0.0)
    return h2 @ w3 + b3


if __name__ == "__main__":
    key = jax.random.PRNGKey(0)
    k_p, k_s, k_a = jax.random.split(key, 3)

    # B deliberately not a multiple of the tile: exercises the ragged last block
    # (2 grid steps at the auto-picked tile_b=256, so v7x keeps both TCs busy).
    B, dim_state, dim_action = 300, 12, 4
    params = init_critic_params(k_p, dim_state, dim_action)
    state = jax.random.normal(k_s, (B, dim_state), jnp.float32)
    action = jax.random.normal(k_a, (B, dim_action), jnp.float32)

    q_ref = critic_reference(state, action, params)

    # Exact path (f32 matmuls + f32 epilogues) -> tight check; also guards the
    # unpadded ragged-last-tile handling.
    prep_f32 = prepare_critic_params(params, compute_dtype=jnp.float32)
    q_f32 = jax.block_until_ready(critic_forward(state, action, prep_f32))
    assert q_f32.shape == (B, 1)
    assert jnp.allclose(q_f32, q_ref, atol=1e-3, rtol=1e-3)

    # Fast path (bf16 matmul operands + bf16 fc1 epilogue, f32 accumulation).
    prep_bf16 = prepare_critic_params(params, compute_dtype=jnp.bfloat16)
    q_bf16 = jax.block_until_ready(critic_forward(state, action, prep_bf16))
    assert q_bf16.shape == (B, 1)
    assert jnp.allclose(q_bf16, q_ref, atol=1e-1, rtol=1e-1)

    print("KERNEL_OK")
</pallas_src>

<mosaic_0001>
module attributes {stable_mosaic.version = 11 : i64} {
  func.func @_critic_kernel(%arg0: i32, %arg1: memref<256x16xf32, #tpu.memory_space<vmem>>, %arg2: memref<16x256xf32, #tpu.memory_space<vmem>>, %arg3: memref<1x256xf32, #tpu.memory_space<vmem>>, %arg4: memref<256x256xf32, #tpu.memory_space<vmem>>, %arg5: memref<1x256xf32, #tpu.memory_space<vmem>>, %arg6: memref<1x256xf32, #tpu.memory_space<vmem>>, %arg7: memref<1xf32, #tpu.memory_space<smem>>, %arg8: memref<256x1xf32, #tpu.memory_space<vmem>>) attributes {dimension_semantics = [#tpu.dimension_semantics<parallel>], iteration_bounds = array<i64: 2>, scalar_prefetch = 0 : i64, scratch_operands = 0 : i64, tpu.core_type = #tpu.core_type<tc>, window_params = [{transform_indices = @transform_0, window_bounds = array<i64: 256, 16>}, {pipeline_mode = #tpu.pipeline_mode<synchronous>, transform_indices = @transform_1, window_bounds = array<i64: 16, 256>}, {pipeline_mode = #tpu.pipeline_mode<synchronous>, transform_indices = @transform_2, window_bounds = array<i64: 1, 256>}, {pipeline_mode = #tpu.pipeline_mode<synchronous>, transform_indices = @transform_3, window_bounds = array<i64: 256, 256>}, {pipeline_mode = #tpu.pipeline_mode<synchronous>, transform_indices = @transform_4, window_bounds = array<i64: 1, 256>}, {pipeline_mode = #tpu.pipeline_mode<synchronous>, transform_indices = @transform_5, window_bounds = array<i64: 1, 256>}, {transform_indices = @transform_6, window_bounds = array<i64: 1>}, {transform_indices = @transform_7, window_bounds = array<i64: 256, 1>}]} {
    %c0 = arith.constant 0 : index
    %c0_0 = arith.constant 0 : index
    %0 = vector.load %arg1[%c0, %c0_0] : memref<256x16xf32, #tpu.memory_space<vmem>>, vector<256x16xf32>
    %c0_1 = arith.constant 0 : index
    %c0_2 = arith.constant 0 : index
    %1 = vector.load %arg2[%c0_1, %c0_2] : memref<16x256xf32, #tpu.memory_space<vmem>>, vector<16x256xf32>
    %cst = arith.constant dense<0.000000e+00> : vector<256x256xf32>
    %2 = tpu.matmul %0, %1, %cst {dimension_numbers = #tpu.dot_dimension_numbers<[1], [0], [0], [1], [0, 0, 1, 1], [], []>} : vector<256x16xf32>, vector<16x256xf32>, vector<256x256xf32> -> vector<256x256xf32>
    %c0_3 = arith.constant 0 : index
    %c0_4 = arith.constant 0 : index
    %3 = vector.load %arg3[%c0_3, %c0_4] : memref<1x256xf32, #tpu.memory_space<vmem>>, vector<1x256xf32>
    %4 = vector.broadcast %3 : vector<1x256xf32> to vector<256x256xf32>
    %5 = arith.addf %2, %4 : vector<256x256xf32>
    %cst_5 = arith.constant 0.000000e+00 : f32
    %6 = vector.broadcast %cst_5 : f32 to vector<256x256xf32>
    %7 = arith.maximumf %5, %6 : vector<256x256xf32>
    %c0_6 = arith.constant 0 : index
    %c0_7 = arith.constant 0 : index
    %8 = vector.load %arg4[%c0_6, %c0_7] : memref<256x256xf32, #tpu.memory_space<vmem>>, vector<256x256xf32>
    %cst_8 = arith.constant dense<0.000000e+00> : vector<256x256xf32>
    %9 = tpu.matmul %7, %8, %cst_8 {dimension_numbers = #tpu.dot_dimension_numbers<[1], [0], [0], [1], [0, 0, 1, 1], [], []>} : vector<256x256xf32>, vector<256x256xf32>, vector<256x256xf32> -> vector<256x256xf32>
    %c0_9 = arith.constant 0 : index
    %c0_10 = arith.constant 0 : index
    %10 = vector.load %arg5[%c0_9, %c0_10] : memref<1x256xf32, #tpu.memory_space<vmem>>, vector<1x256xf32>
    %11 = vector.broadcast %10 : vector<1x256xf32> to vector<256x256xf32>
    %12 = arith.addf %9, %11 : vector<256x256xf32>
    %cst_11 = arith.constant 0.000000e+00 : f32
    %13 = vector.broadcast %cst_11 : f32 to vector<256x256xf32>
    %14 = arith.maximumf %12, %13 : vector<256x256xf32>
    %c0_12 = arith.constant 0 : index
    %c0_13 = arith.constant 0 : index
    %15 = vector.load %arg6[%c0_12, %c0_13] : memref<1x256xf32, #tpu.memory_space<vmem>>, vector<1x256xf32>
    %16 = vector.broadcast %15 : vector<1x256xf32> to vector<256x256xf32>
    %17 = arith.mulf %14, %16 : vector<256x256xf32>
    %cst_14 = arith.constant dense<0.000000e+00> : vector<256xf32>
    %18 = vector.multi_reduction <add>, %17, %cst_14 [1] : vector<256x256xf32> to vector<256xf32>
    %19 = vector.shape_cast %18 : vector<256xf32> to vector<256x1xf32>
    %c0_15 = arith.constant 0 : index
    %20 = memref.load %arg7[%c0_15] : memref<1xf32, #tpu.memory_space<smem>>
    %21 = vector.broadcast %20 : f32 to vector<256x1xf32>
    %22 = arith.addf %19, %21 : vector<256x1xf32>
    %c0_16 = arith.constant 0 : index
    %c0_17 = arith.constant 0 : index
    %23 = vector.load %arg8[%c0_16, %c0_17] : memref<256x1xf32, #tpu.memory_space<vmem>>, vector<256x1xf32>
    tpu.vector_store %arg8[%c0_16, %c0_17], %22 {strides = array<i32>} : memref<256x1xf32, #tpu.memory_space<vmem>>, vector<256x1xf32>,
    return
  }
  func.func @transform_0(%arg0: i32) -> (i32, i32) {
    %c0_i32 = arith.constant 0 : i32
    %c0_i32_0 = arith.constant 0 : i32
    return %arg0, %c0_i32 : i32, i32
  }
  func.func @transform_1(%arg0: i32) -> (i32, i32) {
    %c0_i32 = arith.constant 0 : i32
    %c0_i32_0 = arith.constant 0 : i32
    %c0_i32_1 = arith.constant 0 : i32
    return %c0_i32, %c0_i32_0 : i32, i32
  }
  func.func @transform_2(%arg0: i32) -> (i32, i32) {
    %c0_i32 = arith.constant 0 : i32
    %c0_i32_0 = arith.constant 0 : i32
    %c0_i32_1 = arith.constant 0 : i32
    return %c0_i32, %c0_i32_0 : i32, i32
  }
  func.func @transform_3(%arg0: i32) -> (i32, i32) {
    %c0_i32 = arith.constant 0 : i32
    %c0_i32_0 = arith.constant 0 : i32
    %c0_i32_1 = arith.constant 0 : i32
    return %c0_i32, %c0_i32_0 : i32, i32
  }
  func.func @transform_4(%arg0: i32) -> (i32, i32) {
    %c0_i32 = arith.constant 0 : i32
    %c0_i32_0 = arith.constant 0 : i32
    %c0_i32_1 = arith.constant 0 : i32
    return %c0_i32, %c0_i32_0 : i32, i32
  }
  func.func @transform_5(%arg0: i32) -> (i32, i32) {
    %c0_i32 = arith.constant 0 : i32
    %c0_i32_0 = arith.constant 0 : i32
    %c0_i32_1 = arith.constant 0 : i32
    return %c0_i32, %c0_i32_0 : i32, i32
  }
  func.func @transform_6(%arg0: i32) -> i32 {
    %c0_i32 = arith.constant 0 : i32
    %c0_i32_0 = arith.constant 0 : i32
    return %c0_i32 : i32
  }
  func.func @transform_7(%arg0: i32) -> (i32, i32) {
    %c0_i32 = arith.constant 0 : i32
    %c0_i32_0 = arith.constant 0 : i32
    return %arg0, %c0_i32 : i32, i32
  }
}

</mosaic_0001>

<bundles_post_ra>
// kernel: critic_forward.1
= control target key start
LH: loop header
LB: loop body
LE: loop exit
PB: predicated region body
PF: predicated region fallthrough
CT: control target
= control target key end

     0   :  { %s2942_s0 = inlined_call_operand.vmem [shape: f32[300,16], index: 0, kind: input, shape index: {}]   ;;  %s2943_s1 = inlined_call_operand.vmem [shape: f32[16,256], index: 1, kind: input, shape index: {}]   ;;  %s2944_s2 = inlined_call_operand.vmem [shape: f32[1,256], index: 2, kind: input, shape index: {}]   ;;  %s2945_s3 = inlined_call_operand.hbm [shape: f32[256,256], index: 3, kind: input, shape index: {}]   ;;  %s2946_s4 = inlined_call_operand.vmem [shape: f32[1,256], index: 4, kind: input, shape index: {}]   ;;  %s2947_s5 = inlined_call_operand.vmem [shape: f32[1,256], index: 5, kind: input, shape index: {}]   ;;  %s2948_s6 = inlined_call_operand.<no memory space> [shape: f32[1], index: 6, kind: input, shape index: {}]   ;;  %s2949_s7 = inlined_call_operand.vmem [shape: f32[300,1], index: 7, kind: output, shape index: {}]  }
   0x1   :  { %12 = sst [smem:[#allocation2]] %s2948_s6 }
   0x2   :  { %13 = vsyncpa [#allocation4], 0  ;;  %s2162_s26 = smov 0   ;;  %s2164_s27 = smov 0  }
   0x3   :  { %s2166_s28 = smov 0  }
   0x4 LB: > { %s2175_s6 = sadd.s32 4294967295, %s2081_s28   ;;  %s2177_s29 = sadd.s32 1, %s2081_s28   ;;  %s2081_s28 = sphi %s2166_s28, %s2959_s28   ;;  %s2077_s27 = sphi %s2164_s27, %s2958_s27   ;;  %s2073_s26 = sphi %s2162_s26, %s2957_s26  }
   0x5   : > { %s175_s30 = ssub.s32 %s2081_s28, %s2177_s29  ;;  %s178_s8 = sadd.s32 1, %s2077_s27 }
   0x6   : > { %p176_p0 = scmp.eq.s32.totalorder %s175_s30, 0  ;;  %p188_p1 = scmp.ne.s32.totalorder %s2077_s27, %s2073_s26 }
   0x7   : > { %p189_p2 = scmp.eq.s32.totalorder %s2175_s6, 1  ;;  %p1771_p3 = scmp.ge.s32.totalorder %s2081_s28, 1 }
   0x8   : > { %s2185_s9 = scalar_select %p176_p0, %s2077_s27, %s178_s8  }
   0x9   : > { %p2187_p4 = por %p189_p2, %p188_p1  ;;  %p202_p5 = scmp.lt.s32.totalorder %s2081_s28, 3 }
   0xa   : > { %p1903_p6 = scmp.eq.s32.totalorder %s2175_s6, 0  ;;  %s2115_s12 = smov [#allocation3]  }
   0xb   : > { %p2192_p7 = pnand %p1771_p3, %p202_p5  ;;  %s220_s13 = sshll.u32 %s2115_s12, 4  ;;  %s221_s13 = int_to_ptr.vmem [resolvable:$true] %s220_s13 }
   0xc   : > { %s2008_s14 = scalar_lea.vmem %s221_s13, 8192  ;;  %p2016_p0 = scmp.lt.s32.totalorder %s221_s13, %s221_s13 }
   0xd   : > { %p1899_p8 = pneg %p2192_p7  ;;  %p2009_p11 = scmp.ne.s32.totalorder %s221_s13, %s2008_s14 }
   0xe   : > { %p2017_p1 = scmp.lt.s32.totalorder %s2008_s14, %s2008_s14 }
   0xf   : > { %p1900_p9 = pnand %p1903_p6, %p1899_p8 }
  0x10   : > { %p2018_p2 = por %p2017_p1, %p2016_p0 }
  0x11   : > { %p1999_p10 = pneg %p1900_p9 }
  0x13   : > { %p2011_p12 = pnand %p2009_p11, %p1999_p10 }
  0x15   : > { %p2012_p13 = pneg %p2011_p12 }
  0x17   : > { %p2019_p3 = pnand %p2018_p2, %p2012_p13 }
  0x19   : > { %2022 = shalt.err (!%p2019_p3)
}
  0x1a   : > { %s2116_s15 = smov 256   ;;  %s2117_s16 = smov 16  }
  0x1b   : > { %1902 = dma.hbm_to_vmem [thread:$0]  (!%p1900_p9), %s2945_s3, 8192, %s221_s13, [#allocation4], %s2116_s15, %s2116_s15, %s2117_s16  }
  0x1c   : > { %262 = sbr.rel (%p2192_p7) target bundleno = 758 (0x2f6), region = 48 }
  0x21   : > { %2068 = dma.done.wait (%p1903_p6), [#allocation4], 8192  }
  0x22   : > { %2070 = vsyncadd (%p1903_p6), [#allocation4], 4294959104  ;;  %s2210_s19 = sshll.u32 %s2175_s6, 5  ;;  %v2118_v0 = vmov 0.0   ;;  %v351_v1 = vld [vmem:[%s2943_s1 + $0x18] sm:$0xff]  ;;  %v350_v2 = vld [vmem:[%s2943_s1 + $0x10] sm:$0xff] }
  0x23   : > { %525 = vmatprep.mubr.f32.mxu0 %v2118_v0  ;;  %p302_p5 = scmp.lt.s32.totalorder %s2210_s19, 37  ;;  %v349_v3 = vld [vmem:[%s2943_s1 + $0x8] sm:$0xff]  ;;  %489 = vmatprep.subr.mxu0 %v351_v1  ;;  %v348_v4 = vld [vmem:[%s2943_s1] sm:$0xff]  ;;  %vm364_vm0 = vcmask 130048   ;;  %v813_v8 = vld [vmem:[#allocation3 + $0xf8] sm:$0xff]  ;;  %s1351_s22 = sld [smem:[#allocation2]] }
  0x24   : > { %490 = vmatpush1.msra.mxu0 %v350_v2  ;;  %v812_v9 = vld [vmem:[#allocation3 + $0xf0] sm:$0xff]  ;;  %v811_v10 = vld [vmem:[#allocation3 + $0xe8] sm:$0xff]  ;;  %1831 = vmatprep.subr.mxu1 %v813_v8  ;;  %v810_v11 = vld [vmem:[#allocation3 + $0xe0] sm:$0xff]  ;;  %s294_s23 = sand.u32 1, %s2073_s26   ;;  %vm1385_vm1 = vcmask 7168   ;;  %s1426_s26 = ssub.s32 (%p2187_p4), 38, %s2210_s19 }
  0x25   : > { %s303_s20 = scalar_select %p302_p5, %s2210_s19, 37  ;;  %491 = vmatprep.subr.mxu0 %v349_v3  ;;  %1863 = vmatpush1.msra.mxu1 %v812_v9  ;;  %v809_v13 = vld [vmem:[#allocation3 + $0xd8] sm:$0xff]  ;;  %v808_v14 = vld [vmem:[#allocation3 + $0xd0] sm:$0xff]  ;;  %v807_v15 = vld [vmem:[#allocation3 + $0xc8] sm:$0xff] }
  0x26   : > { %492 = vmatpush1.msra.mxu0 %v348_v4  ;;  %1832 = vmatprep.subr.mxu1 %v811_v10  ;;  %v806_v16 = vld [vmem:[#allocation3 + $0xc0] sm:$0xff]  ;;  %v805_v18 = vld [vmem:[#allocation3 + $0xb8] sm:$0xff]  ;;  %v804_v19 = vld [vmem:[#allocation3 + $0xb0] sm:$0xff]  ;;  %s1828_s28 = sshll.u32 (%p2187_p4), %s2175_s6, 8  ;;  %p1427_p6 = scmp.lt.s32.totalorder (%p2187_p4), %s1426_s26, 32 }
  0x27   : > { %s1778_s21 = sshll.u32 %s303_s20, 3  ;;  %858 = vmatprep.subr.mxu0 %v813_v8  ;;  %1864 = vmatpush1.msra.mxu1 %v810_v11  ;;  %v803_v20 = vld [vmem:[#allocation3 + $0xa8] sm:$0xff]  ;;  %v802_v21 = vld [vmem:[#allocation3 + $0xa0] sm:$0xff]  ;;  %v801_v23 = vld [vmem:[#allocation3 + $0x98] sm:$0xff]  ;;  %s2810_s11 = scalar_lea.vmem (%p2187_p4), %s2949_s7, %s1828_s28  }
  0x28   : > { %s2218_s24 = scalar_lea.vmem %s2942_s0, %s1778_s21  ;;  %1833 = vmatprep.subr.mxu1 %v809_v13  ;;  %v800_v24 = vld [vmem:[#allocation3 + $0x90] sm:$0xff]  ;;  %v799_v25 = vld [vmem:[#allocation3 + $0x88] sm:$0xff]  ;;  %v798_v26 = vld [vmem:[#allocation3 + $0x80] sm:$0xff] }
  0x29   : > { %v316_v5 = vld [vmem:[%s2218_s24] sm:$0xff]  ;;  %v317_v6 = vld [vmem:[%s2218_s24 + $0x8] sm:$0xff]  ;;  %v318_v7 = vld [vmem:[%s2218_s24 + $0x10] sm:$0xff]  ;;  %1865 = vmatpush1.msra.mxu1 %v808_v14 }
  0x2a   : > { %1779 = vmatmul.mubr.msk.f32.vlgmr.msra.gmra.mxu0 %vm364_vm0, %v316_v5  ;;  %v319_v12 = vld [vmem:[%s2218_s24 + $0x18] sm:$0xff]  ;;  %v320_v17 = vld [vmem:[%s2218_s24 + $0x20] sm:$0xff]  ;;  %v321_v22 = vld [vmem:[%s2218_s24 + $0x28] sm:$0xff]  ;;  %1834 = vmatprep.subr.mxu1 %v807_v15 }
  0x2b   : > { %531 = vmatprep.mubr.f32.mxu0 %v2118_v0  ;;  %859 = vmatpush1.msra.mxu0 %v812_v9  ;;  %v322_v27 = vld [vmem:[%s2218_s24 + $0x30] sm:$0xff]  ;;  %v797_v28 = vld [vmem:[#allocation3 + $0x78] sm:$0xff]  ;;  %v795_v30 = vld [vmem:[#allocation3 + $0x68] sm:$0xff] }
  0x2c   : > { %860 = vmatprep.subr.mxu0 %v811_v10  ;;  %1866 = vmatpush1.msra.mxu1 %v806_v16  ;;  %v796_v29 = vld [vmem:[#allocation3 + $0x70] sm:$0xff]  ;;  %v794_v31 = vld [vmem:[#allocation3 + $0x60] sm:$0xff]  ;;  %v323_v32 = vld [vmem:[%s2218_s24 + $0x38] sm:$0xff] }
  0x2d   : > { %861 = vmatpush1.msra.mxu0 %v810_v11  ;;  %1835 = vmatprep.subr.mxu1 %v805_v18  ;;  %v2254_v33 = vld [vmem:[#allocation3 + $0x58] sm:$0xff]  ;;  %v2256_v34 = vld [vmem:[#allocation3 + $0x50] sm:$0xff]  ;;  %v2258_v35 = vld [vmem:[#allocation3 + $0x48] sm:$0xff] }
  0x2e   : > { %1780 = vmatmul.mubr.msk.f32.gmra.mxu0 %vm364_vm0, %v317_v6  ;;  %862 = vmatprep.subr.mxu0 %v809_v13  ;;  %v2262_v36 = vld [vmem:[#allocation3 + $0x40] sm:$0xff]  ;;  %v2267_v38 = vld [vmem:[#allocation3 + $0x38] sm:$0xff]  ;;  %v2270_v39 = vld [vmem:[#allocation3 + $0x30] sm:$0xff] }
  0x2f   : > { %537 = vmatprep.mubr.f32.mxu0 %v2118_v0  ;;  %863 = vmatpush1.msra.mxu0 %v808_v14  ;;  %v324_v37 = vld [vmem:[%s2218_s24 + $0x40] sm:$0xff]  ;;  %v2273_v40 = vld [vmem:[#allocation3 + $0x28] sm:$0xff]  ;;  %v2282_v43 = vld [vmem:[#allocation3 + $0x18] sm:$0xff] }
  0x30   : > { %864 = vmatprep.subr.mxu0 %v807_v15  ;;  %1867 = vmatpush1.msra.mxu1 %v804_v19  ;;  %v2277_v41 = vld [vmem:[#allocation3 + $0x20] sm:$0xff]  ;;  %v325_v42 = vld [vmem:[%s2218_s24 + $0x48] sm:$0xff]  ;;  %v2285_v44 = vld [vmem:[#allocation3 + $0x10] sm:$0xff] }
  0x31   : > { %865 = vmatpush1.msra.mxu0 %v806_v16  ;;  %1836 = vmatprep.subr.mxu1 %v803_v20  ;;  %v2288_v45 = vld [vmem:[#allocation3 + $0x8] sm:$0xff]  ;;  %v2292_v46 = vld [vmem:[#allocation3] sm:$0xff]  ;;  %v326_v47 = vld [vmem:[%s2218_s24 + $0x50] sm:$0xff] }
  0x32   : > { %1781 = vmatmul.mubr.msk.f32.gmra.mxu0 %vm364_vm0, %v318_v7  ;;  %866 = vmatprep.subr.mxu0 %v805_v18  ;;  %v2297_v48 = vld [vmem:[#allocation3 + $0x1f8] sm:$0xff]  ;;  %v2300_v49 = vld [vmem:[#allocation3 + $0x1f0] sm:$0xff]  ;;  %v2303_v50 = vld [vmem:[#allocation3 + $0x1e8] sm:$0xff] }
  0x33   : > { %543 = vmatprep.mubr.f32.mxu0 %v2118_v0  ;;  %867 = vmatpush1.msra.mxu0 %v804_v19  ;;  %v2307_v51 = vld [vmem:[#allocation3 + $0x1e0] sm:$0xff]  ;;  %v327_v52 = vld [vmem:[%s2218_s24 + $0x58] sm:$0xff]  ;;  %v2315_v54 = vld [vmem:[#allocation3 + $0x1d0] sm:$0xff] }
  0x34   : > { %868 = vmatprep.subr.mxu0 %v803_v20  ;;  %1868 = vmatpush1.msra.mxu1 %v802_v21  ;;  %v2312_v53 = vld [vmem:[#allocation3 + $0x1d8] sm:$0xff]  ;;  %v2318_v55 = vld [vmem:[#allocation3 + $0x1c8] sm:$0xff]  ;;  %v2322_v56 = vld [vmem:[#allocation3 + $0x1c0] sm:$0xff] }
  0x35   : > { %869 = vmatpush1.msra.mxu0 %v802_v21  ;;  %1837 = vmatprep.subr.mxu1 %v801_v23  ;;  %v328_v57 = vld [vmem:[%s2218_s24 + $0x60] sm:$0xff]  ;;  %v2327_v58 = vld [vmem:[#allocation3 + $0x1b8] sm:$0xff]  ;;  %v2330_v59 = vld [vmem:[#allocation3 + $0x1b0] sm:$0xff] }
  0x36   : > { %1782 = vmatmul.mubr.msk.f32.gmra.mxu0 %vm364_vm0, %v319_v12  ;;  %870 = vmatprep.subr.mxu0 %v801_v23  ;;  %v2334_v60 = vld [vmem:[#allocation3 + $0x1a8] sm:$0xff]  ;;  %v2339_v61 = vld [vmem:[#allocation3 + $0x1a0] sm:$0xff]  ;;  %v2344_v63 = vld [vmem:[#allocation3 + $0x198] sm:$0xff] }
  0x37   : > { %549 = vmatprep.mubr.f32.mxu0 %v2118_v0  ;;  %871 = vmatpush1.msra.mxu0 %v800_v24  ;;  %v329_v62 = vld [vmem:[%s2218_s24 + $0x68] sm:$0xff]  ;;  %v2347_v1 = vld [vmem:[#allocation3 + $0x190] sm:$0xff]  ;;  %v2356_v3 = vld [vmem:[#allocation3 + $0x180] sm:$0xff] }
  0x38   : > { %872 = vmatprep.subr.mxu0 %v799_v25  ;;  %1869 = vmatpush1.msra.mxu1 %v800_v24  ;;  %v2351_v2 = vld [vmem:[#allocation3 + $0x188] sm:$0xff]  ;;  %v330_v4 = vld [vmem:[%s2218_s24 + $0x70] sm:$0xff]  ;;  %v2361_v5 = vld [vmem:[#allocation3 + $0x178] sm:$0xff] }
  0x39   : > { %873 = vmatpush1.msra.mxu0 %v798_v26  ;;  %1838 = vmatprep.subr.mxu1 %v799_v25  ;;  %v2364_v6 = vld [vmem:[#allocation3 + $0x170] sm:$0xff]  ;;  %v2368_v7 = vld [vmem:[#allocation3 + $0x168] sm:$0xff]  ;;  %v2373_v8 = vld [vmem:[#allocation3 + $0x160] sm:$0xff] }
  0x3a   : > { %1783 = vmatmul.mubr.msk.f32.gmra.mxu0 %vm364_vm0, %v320_v17  ;;  %874 = vmatprep.subr.mxu0 %v797_v28  ;;  %v331_v9 = vld [vmem:[%s2218_s24 + $0x78] sm:$0xff]  ;;  %v2381_v11 = vld [vmem:[#allocation3 + $0x150] sm:$0xff]  ;;  %v2385_v12 = vld [vmem:[#allocation3 + $0x148] sm:$0xff] }
  0x3b   : > { %555 = vmatprep.mubr.f32.mxu0 %v2118_v0  ;;  %875 = vmatpush1.msra.mxu0 %v796_v29  ;;  %v2378_v10 = vld [vmem:[#allocation3 + $0x158] sm:$0xff]  ;;  %v2390_v13 = vld [vmem:[#allocation3 + $0x140] sm:$0xff]  ;;  %v2403_v16 = vld [vmem:[#allocation3 + $0x130] sm:$0xff] }
  0x3c   : > { %876 = vmatprep.subr.mxu0 %v795_v30  ;;  %1870 = vmatpush1.msra.mxu1 %v798_v26  ;;  %v332_v14 = vld [vmem:[%s2218_s24 + $0x80] sm:$0xff]  ;;  %v2398_v15 = vld [vmem:[#allocation3 + $0x138] sm:$0xff]  ;;  %v333_v17 = vld [vmem:[%s2218_s24 + $0x88] sm:$0xff] }
  0x3d   : > { %877 = vmatpush1.msra.mxu0 %v794_v31  ;;  %1839 = vmatprep.subr.mxu1 %v797_v28  ;;  %v819_v18 = vld [vmem:[#allocation3 + $0x128] sm:$0xff]  ;;  %v818_v19 = vld [vmem:[#allocation3 + $0x120] sm:$0xff]  ;;  %v817_v20 = vld [vmem:[#allocation3 + $0x118] sm:$0xff] }
  0x3e   : > { %1784 = vmatmul.mubr.msk.f32.gmra.mxu0 %vm364_vm0, %v321_v22  ;;  %878 = vmatprep.subr.mxu0 %v2254_v33  ;;  %v816_v21 = vld [vmem:[#allocation3 + $0x110] sm:$0xff]  ;;  %v815_v23 = vld [vmem:[#allocation3 + $0x108] sm:$0xff]  ;;  %v814_v24 = vld [vmem:[#allocation3 + $0x100] sm:$0xff] }
  0x3f   : > { %561 = vmatprep.mubr.f32.mxu0 %v2118_v0  ;;  %879 = vmatpush1.msra.mxu0 %v2256_v34  ;;  %v334_v22 = vld [vmem:[%s2218_s24 + $0x90] sm:$0xff]  ;;  %v335_v25 = vld [vmem:[%s2218_s24 + $0x98] sm:$0xff]  ;;  %v336_v26 = vld [vmem:[%s2218_s24 + $0xa0] sm:$0xff] }
  0x40   : > { %880 = vmatprep.subr.mxu0 %v2258_v35  ;;  %1871 = vmatpush1.msra.mxu1 %v796_v29  ;;  %v338_v28 = vld [vmem:[%s2218_s24 + $0xb0] sm:$0xff]  ;;  %v339_v29 = vld [vmem:[%s2218_s24 + $0xb8] sm:$0xff] }
  0x41   : > { %881 = vmatpush1.msra.mxu0 %v2262_v36  ;;  %1840 = vmatprep.subr.mxu1 %v795_v30  ;;  %v340_v30 = vld [vmem:[%s2218_s24 + $0xc0] sm:$0xff] }
  0x42   : > { %1785 = vmatmul.mubr.msk.f32.gmra.mxu0 %vm364_vm0, %v322_v27  ;;  %882 = vmatprep.subr.mxu0 %v2267_v38  ;;  %v337_v27 = vld [vmem:[%s2218_s24 + $0xa8] sm:$0xff] }
  0x43   : > { %567 = vmatprep.mubr.f32.mxu0 %v2118_v0  ;;  %883 = vmatpush1.msra.mxu0 %v2270_v39 }
  0x44   : > { %884 = vmatprep.subr.mxu0 %v2273_v40  ;;  %1872 = vmatpush1.msra.mxu1 %v794_v31  ;;  %v341_v31 = vld [vmem:[%s2218_s24 + $0xc8] sm:$0xff] }
  0x45   : > { %885 = vmatpush1.msra.mxu0 %v2277_v41  ;;  %1841 = vmatprep.subr.mxu1 %v2254_v33  ;;  %v343_v33 = vld [vmem:[%s2218_s24 + $0xd8] sm:$0xff] }
  0x46   : > { %1786 = vmatmul.mubr.msk.f32.gmra.mxu0 %vm364_vm0, %v323_v32  ;;  %886 = vmatprep.subr.mxu0 %v2282_v43  ;;  %v342_v32 = vld [vmem:[%s2218_s24 + $0xd0] sm:$0xff] }
  0x47   : > { %573 = vmatprep.mubr.f32.mxu0 %v2118_v0  ;;  %887 = vmatpush1.msra.mxu0 %v2285_v44 }
  0x48   : > { %888 = vmatprep.subr.mxu0 %v2288_v45  ;;  %1873 = vmatpush1.msra.mxu1 %v2256_v34  ;;  %v344_v34 = vld [vmem:[%s2218_s24 + $0xe0] sm:$0xff] }
  0x49   : > { %889 = vmatpush1.msra.mxu0 %v2292_v46  ;;  %1842 = vmatprep.subr.mxu1 %v2258_v35  ;;  %v345_v35 = vld [vmem:[%s2218_s24 + $0xe8] sm:$0xff] }
  0x4a   : > { %1787 = vmatmul.mubr.msk.f32.gmra.mxu0 %vm364_vm0, %v324_v37  ;;  %890 = vmatprep.subr.mxu0 %v2297_v48  ;;  %v347_v37 = vld [vmem:[%s2218_s24 + $0xf8] sm:$0xff] }
  0x4b   : > { %579 = vmatprep.mubr.f32.mxu0 %v2118_v0  ;;  %891 = vmatpush2.msra.mxu0 %v2300_v49 }
  0x4c   : > { %892 = vmatprep.subr.mxu0 %v2303_v50  ;;  %1874 = vmatpush1.msra.mxu1 %v2262_v36  ;;  %v346_v36 = vld [vmem:[%s2218_s24 + $0xf0] sm:$0xff]  ;;  %s1776_s24 = sshll.u32 %s294_s23, 8 }
  0x4d   : > { %893 = vmatpush2.msra.mxu0 %v2307_v51  ;;  %1843 = vmatprep.subr.mxu1 %v2267_v38  ;;  %v354_v38 = vlaneseq  ;;  %s2706_s25 = scalar_lea.vmem [#allocation5], %s1776_s24  }
  0x4e   : > { %1788 = vmatmul.mubr.msk.f32.gmra.mxu0 %vm364_vm0, %v325_v42  ;;  %894 = vmatprep.subr.mxu0 %v2312_v53 }
  0x4f   : > { %585 = vmatprep.mubr.f32.mxu0 %v2118_v0  ;;  %895 = vmatpush2.msra.mxu0 %v2315_v54 }
  0x50   : > { %896 = vmatprep.subr.mxu0 %v2318_v55  ;;  %1875 = vmatpush1.msra.mxu1 %v2270_v39  ;;  %v355_v39 = vshrl.u32 %v354_v38, 7 }
  0x51   : > { %897 = vmatpush2.msra.mxu0 %v2322_v56  ;;  %1844 = vmatprep.subr.mxu1 %v2273_v40 }
  0x52   : > { %1789 = vmatmul.mubr.msk.f32.gmra.mxu0 %vm364_vm0, %v326_v47  ;;  %898 = vmatprep.subr.mxu0 %v2327_v58  ;;  %v2479_v40 = vsub.s32 0, %v355_v39  ;;  %v2484_v42 = vsub.s32 1, %v355_v39 }
  0x53   : > { %591 = vmatprep.mubr.f32.mxu0 %v2118_v0  ;;  %899 = vmatpush2.msra.mxu0 %v2330_v59 }
  0x54   : > { %900 = vmatprep.subr.mxu0 %v2334_v60  ;;  %1876 = vmatpush1.msra.mxu1 %v2277_v41  ;;  %v352_v41 = vld [vmem:[%s2944_s2] sm:$0x3] }
  0x55   : > { %901 = vmatpush2.msra.mxu0 %v2339_v61  ;;  %1845 = vmatprep.subr.mxu1 %v2282_v43  ;;  %v2487_v43 = vrot.slane %v352_v41, %v2479_v40 }
  0x56   : > { %1790 = vmatmul.mubr.msk.f32.gmra.mxu0 %vm364_vm0, %v327_v52  ;;  %902 = vmatprep.subr.mxu0 %v2344_v63 }
  0x57   : > { %597 = vmatprep.mubr.f32.mxu0 %v2118_v0  ;;  %903 = vmatpush2.msra.mxu0 %v2347_v1 }
  0x58   : > { %904 = vmatprep.subr.mxu0 %v2351_v2  ;;  %1877 = vmatpush1.msra.mxu1 %v2285_v44  ;;  %v2490_v44 = vrot.slane %v352_v41, %v2484_v42 }
  0x59   : > { %905 = vmatpush2.msra.mxu0 %v2356_v3  ;;  %1846 = vmatprep.subr.mxu1 %v2288_v45 }
  0x5a   : > { %1791 = vmatmul.mubr.msk.f32.gmra.mxu0 %vm364_vm0, %v328_v57  ;;  %906 = vmatprep.subr.mxu0 %v2361_v5 }
  0x5b   : > { %603 = vmatprep.mubr.f32.mxu0 %v2118_v0  ;;  %907 = vmatpush2.msra.mxu0 %v2364_v6 }
  0x5c   : > { %908 = vmatprep.subr.mxu0 %v2368_v7  ;;  %1878 = vmatpush1.msra.mxu1 %v2292_v46 }
  0x5d   : > { %909 = vmatpush2.msra.mxu0 %v2373_v8  ;;  %1847 = vmatprep.subr.mxu1 %v2297_v48 }
  0x5e   : > { %1792 = vmatmul.mubr.msk.f32.gmra.mxu0 %vm364_vm0, %v329_v62  ;;  %910 = vmatprep.subr.mxu0 %v2378_v10 }
  0x5f   : > { %609 = vmatprep.mubr.f32.mxu0 %v2118_v0  ;;  %911 = vmatpush2.msra.mxu0 %v2381_v11 }
  0x60   : > { %912 = vmatprep.subr.mxu0 %v2385_v12  ;;  %1879 = vmatpush2.msra.mxu1 %v2300_v49 }
  0x61   : > { %913 = vmatpush2.msra.mxu0 %v2390_v13  ;;  %1848 = vmatprep.subr.mxu1 %v2303_v50 }
  0x62   : > { %1793 = vmatmul.mubr.msk.f32.gmra.mxu0 %vm364_vm0, %v330_v4  ;;  %914 = vmatprep.subr.mxu0 %v2398_v15 }
  0x63   : > { %615 = vmatprep.mubr.f32.mxu0 %v2118_v0  ;;  %915 = vmatpush2.msra.mxu0 %v2403_v16 }
  0x64   : > { %916 = vmatprep.subr.mxu0 %v819_v18  ;;  %1880 = vmatpush2.msra.mxu1 %v2307_v51 }
  0x65   : > { %917 = vmatpush2.msra.mxu0 %v818_v19  ;;  %1849 = vmatprep.subr.mxu1 %v2312_v53 }
  0x66   : > { %1794 = vmatmul.mubr.msk.f32.gmra.mxu0 %vm364_vm0, %v331_v9  ;;  %918 = vmatprep.subr.mxu0 %v817_v20 }
  0x67   : > { %621 = vmatprep.mubr.f32.mxu0 %v2118_v0  ;;  %919 = vmatpush2.msra.mxu0 %v816_v21 }
  0x68   : > { %920 = vmatprep.subr.mxu0 %v815_v23  ;;  %1881 = vmatpush2.msra.mxu1 %v2315_v54 }
  0x69   : > { %921 = vmatpush2.msra.mxu0 %v814_v24  ;;  %1850 = vmatprep.subr.mxu1 %v2318_v55 }
  0x6a   : > { %1795 = vmatmul.mubr.msk.f32.gmra.mxu0 %vm364_vm0, %v332_v14  ;;  %1882 = vmatpush2.msra.mxu1 %v2322_v56 }
  0x6b   : > { %627 = vmatprep.mubr.f32.mxu0 %v2118_v0  ;;  %1851 = vmatprep.subr.mxu1 %v2327_v58 }
  0x6c   : > { %1883 = vmatpush2.msra.mxu1 %v2330_v59 }
  0x6d   : > { %1852 = vmatprep.subr.mxu1 %v2334_v60 }
  0x6e   : > { %1796 = vmatmul.mubr.msk.f32.gmra.mxu0 %vm364_vm0, %v333_v17  ;;  %1884 = vmatpush2.msra.mxu1 %v2339_v61 }
  0x6f   : > { %633 = vmatprep.mubr.f32.mxu0 %v2118_v0  ;;  %1853 = vmatprep.subr.mxu1 %v2344_v63 }
  0x70   : > { %1885 = vmatpush2.msra.mxu1 %v2347_v1 }
  0x71   : > { %1854 = vmatprep.subr.mxu1 %v2351_v2 }
  0x72   : > { %1797 = vmatmul.mubr.msk.f32.gmra.mxu0 %vm364_vm0, %v334_v22  ;;  %1886 = vmatpush2.msra.mxu1 %v2356_v3 }
  0x73   : > { %639 = vmatprep.mubr.f32.mxu0 %v2118_v0  ;;  %1855 = vmatprep.subr.mxu1 %v2361_v5 }
  0x74   : > { %1887 = vmatpush2.msra.mxu1 %v2364_v6 }
  0x75   : > { %1856 = vmatprep.subr.mxu1 %v2368_v7 }
  0x76   : > { %1798 = vmatmul.mubr.msk.f32.gmra.mxu0 %vm364_vm0, %v335_v25  ;;  %1888 = vmatpush2.msra.mxu1 %v2373_v8 }
  0x77   : > { %645 = vmatprep.mubr.f32.mxu0 %v2118_v0  ;;  %1857 = vmatprep.subr.mxu1 %v2378_v10 }
  0x78   : > { %1889 = vmatpush2.msra.mxu1 %v2381_v11 }
  0x79   : > { %1858 = vmatprep.subr.mxu1 %v2385_v12 }
  0x7a   : > { %1799 = vmatmul.mubr.msk.f32.gmra.mxu0 %vm364_vm0, %v336_v26  ;;  %1890 = vmatpush2.msra.mxu1 %v2390_v13 }
  0x7b   : > { %651 = vmatprep.mubr.f32.mxu0 %v2118_v0  ;;  %1859 = vmatprep.subr.mxu1 %v2398_v15 }
  0x7c   : > { %1891 = vmatpush2.msra.mxu1 %v2403_v16 }
  0x7d   : > { %1860 = vmatprep.subr.mxu1 %v819_v18 }
  0x7e   : > { %1800 = vmatmul.mubr.msk.f32.gmra.mxu0 %vm364_vm0, %v337_v27  ;;  %1892 = vmatpush2.msra.mxu1 %v818_v19 }
  0x7f   : > { %657 = vmatprep.mubr.f32.mxu0 %v2118_v0  ;;  %1861 = vmatprep.subr.mxu1 %v817_v20 }
  0x80   : > { %1893 = vmatpush2.msra.mxu1 %v816_v21 }
  0x81   : > { %1862 = vmatprep.subr.mxu1 %v815_v23 }
  0x82   : > { %1801 = vmatmul.mubr.msk.f32.gmra.mxu0 %vm364_vm0, %v338_v28  ;;  %1894 = vmatpush2.msra.mxu1 %v814_v24 }
  0x83   : > { %663 = vmatprep.mubr.f32.mxu0 %v2118_v0 }
  0x86   : > { %1802 = vmatmul.mubr.msk.f32.gmra.mxu0 %vm364_vm0, %v339_v29 }
  0x87   : > { %669 = vmatprep.mubr.f32.mxu0 %v2118_v0 }
  0x8a   : > { %1803 = vmatmul.mubr.msk.f32.gmra.mxu0 %vm364_vm0, %v340_v30 }
  0x8b   : > { %675 = vmatprep.mubr.f32.mxu0 %v2118_v0 }
  0x8e   : > { %1804 = vmatmul.mubr.msk.f32.gmra.mxu0 %vm364_vm0, %v341_v31 }
  0x8f   : > { %681 = vmatprep.mubr.f32.mxu0 %v2118_v0 }
  0x92   : > { %1805 = vmatmul.mubr.msk.f32.gmra.mxu0 %vm364_vm0, %v342_v32 }
  0x93   : > { %687 = vmatprep.mubr.f32.mxu0 %v2118_v0 }
  0x96   : > { %1806 = vmatmul.mubr.msk.f32.gmra.mxu0 %vm364_vm0, %v343_v33 }
  0x97   : > { %693 = vmatprep.mubr.f32.mxu0 %v2118_v0 }
  0x9a   : > { %1807 = vmatmul.mubr.msk.f32.gmra.mxu0 %vm364_vm0, %v344_v34 }
  0x9b   : > { %699 = vmatprep.mubr.f32.mxu0 %v2118_v0 }
  0x9e   : > { %1808 = vmatmul.mubr.msk.f32.gmra.mxu0 %vm364_vm0, %v345_v35 }
  0x9f   : > { %705 = vmatprep.mubr.f32.mxu0 %v2118_v0 }
  0xa2   : > { %1809 = vmatmul.mubr.msk.f32.gmra.mxu0 %vm364_vm0, %v346_v36 }
  0xa3   : > { %711 = vmatprep.mubr.f32.mxu0 %v2118_v0 }
  0xa6   : > { %1810 = vmatmul.mubr.msk.f32.gmra.mxu0 %vm364_vm0, %v347_v37 }
  0xea   : > { %v527_v0 = vpop.f32.mrf.mxu0 }
  0xeb   : > { %v528_v45 = vadd.f32 %v527_v0, %v2487_v43 }
  0xec   : > { %v529_v46 = vpop.f32.mrf.mxu0 }
  0xed   : > { %v530_v47 = vadd.f32 %v529_v46, %v2490_v44  ;;  %v718_v50 = vmax.f32 %v528_v45, 0.0 }
  0xee   : > { %v533_v48 = vpop.f32.mrf.mxu0 }
  0xef   : > { %v719_v49 = vmax.f32 %v530_v47, 0.0  ;;  %v534_v51 = vadd.f32 %v533_v48, %v2487_v43 }
  0xf0   : > { %v535_v52 = vpop.f32.mrf.mxu0 }
  0xf1   : > { %v536_v53 = vadd.f32 %v535_v52, %v2490_v44  ;;  %922 = vmatprep.mubr.f32.mxu0 %v719_v49  ;;  %v720_v56 = vmax.f32 %v534_v51, 0.0 }
  0xf2   : > { %v539_v54 = vpop.f32.mrf.mxu0  ;;  %923 = vmatmul.mubr.f32.vlgmr.msra.gmra.mxu0 %v718_v50 }
  0xf3   : > { %v721_v55 = vmax.f32 %v536_v53, 0.0  ;;  %v540_v57 = vadd.f32 %v539_v54, %v2487_v43 }
  0xf4   : > { %v541_v58 = vpop.f32.mrf.mxu0 }
  0xf5   : > { %v542_v59 = vadd.f32 %v541_v58, %v2490_v44  ;;  %928 = vmatprep.mubr.f32.mxu0 %v721_v55  ;;  %v722_v62 = vmax.f32 %v540_v57, 0.0 }
  0xf6   : > { %v545_v60 = vpop.f32.mrf.mxu0  ;;  %929 = vmatmul.mubr.f32.gmra.mxu0 %v720_v56 }
  0xf7   : > { %v723_v61 = vmax.f32 %v542_v59, 0.0  ;;  %v546_v63 = vadd.f32 %v545_v60, %v2487_v43 }
  0xf8   : > { %v547_v1 = vpop.f32.mrf.mxu0 }
  0xf9   : > { %v548_v2 = vadd.f32 %v547_v1, %v2490_v44  ;;  %934 = vmatprep.mubr.f32.mxu0 %v723_v61  ;;  %v724_v5 = vmax.f32 %v546_v63, 0.0 }
  0xfa   : > { %v551_v3 = vpop.f32.mrf.mxu0  ;;  %935 = vmatmul.mubr.f32.gmra.mxu0 %v722_v62 }
  0xfb   : > { %v725_v4 = vmax.f32 %v548_v2, 0.0  ;;  %v552_v6 = vadd.f32 %v551_v3, %v2487_v43 }
  0xfc   : > { %v553_v7 = vpop.f32.mrf.mxu0 }
  0xfd   : > { %v554_v8 = vadd.f32 %v553_v7, %v2490_v44  ;;  %940 = vmatprep.mubr.f32.mxu0 %v725_v4  ;;  %v726_v11 = vmax.f32 %v552_v6, 0.0 }
  0xfe   : > { %v557_v9 = vpop.f32.mrf.mxu0  ;;  %941 = vmatmul.mubr.f32.gmra.mxu0 %v724_v5 }
  0xff   : > { %v727_v10 = vmax.f32 %v554_v8, 0.0  ;;  %v558_v12 = vadd.f32 %v557_v9, %v2487_v43 }
 0x100   : > { %v559_v13 = vpop.f32.mrf.mxu0 }
 0x101   : > { %v560_v14 = vadd.f32 %v559_v13, %v2490_v44  ;;  %946 = vmatprep.mubr.f32.mxu0 %v727_v10  ;;  %v728_v17 = vmax.f32 %v558_v12, 0.0 }
 0x102   : > { %v563_v15 = vpop.f32.mrf.mxu0  ;;  %947 = vmatmul.mubr.f32.gmra.mxu0 %v726_v11 }
 0x103   : > { %v729_v16 = vmax.f32 %v560_v14, 0.0  ;;  %v564_v18 = vadd.f32 %v563_v15, %v2487_v43 }
 0x104   : > { %v565_v19 = vpop.f32.mrf.mxu0 }
 0x105   : > { %v566_v20 = vadd.f32 %v565_v19, %v2490_v44  ;;  %952 = vmatprep.mubr.f32.mxu0 %v729_v16  ;;  %v730_v23 = vmax.f32 %v564_v18, 0.0 }
 0x106   : > { %v569_v21 = vpop.f32.mrf.mxu0  ;;  %953 = vmatmul.mubr.f32.gmra.mxu0 %v728_v17 }
 0x107   : > { %v731_v22 = vmax.f32 %v566_v20, 0.0  ;;  %v570_v24 = vadd.f32 %v569_v21, %v2487_v43 }
 0x108   : > { %v571_v25 = vpop.f32.mrf.mxu0 }
 0x109   : > { %958 = vmatprep.mubr.f32.mxu0 %v731_v22  ;;  %v572_v26 = vadd.f32 %v571_v25, %v2490_v44  ;;  %v732_v29 = vmax.f32 %v570_v24, 0.0 }
 0x10a   : > { %v575_v27 = vpop.f32.mrf.mxu0  ;;  %959 = vmatmul.mubr.f32.gmra.mxu0 %v730_v23 }
 0x10b   : > { %v733_v28 = vmax.f32 %v572_v26, 0.0  ;;  %v576_v30 = vadd.f32 %v575_v27, %v2487_v43 }
 0x10c   : > { %v577_v31 = vpop.f32.mrf.mxu0 }
 0x10d   : > { %v578_v32 = vadd.f32 %v577_v31, %v2490_v44  ;;  %964 = vmatprep.mubr.f32.mxu1 %v733_v28  ;;  %v734_v35 = vmax.f32 %v576_v30, 0.0 }
 0x10e   : > { %v581_v33 = vpop.f32.mrf.mxu0  ;;  %965 = vmatmul.mubr.f32.vlgmr.msra.gmra.mxu1 %v732_v29 }
 0x10f   : > { %v735_v34 = vmax.f32 %v578_v32, 0.0  ;;  %v582_v36 = vadd.f32 %v581_v33, %v2487_v43 }
 0x110   : > { %v583_v37 = vpop.f32.mrf.mxu0 }
 0x111   : > { %v584_v38 = vadd.f32 %v583_v37, %v2490_v44  ;;  %970 = vmatprep.mubr.f32.mxu1 %v735_v34  ;;  %v736_v0 = vmax.f32 %v582_v36, 0.0 }
 0x112   : > { %v587_v39 = vpop.f32.mrf.mxu0  ;;  %971 = vmatmul.mubr.f32.gmra.mxu1 %v734_v35 }
 0x113   : > { %v737_v41 = vmax.f32 %v584_v38, 0.0  ;;  %v588_v45 = vadd.f32 %v587_v39, %v2487_v43 }
 0x114   : > { %v589_v46 = vpop.f32.mrf.mxu0 }
 0x115   : > { %v590_v47 = vadd.f32 %v589_v46, %v2490_v44  ;;  %976 = vmatprep.mubr.f32.mxu1 %v737_v41  ;;  %v738_v50 = vmax.f32 %v588_v45, 0.0 }
 0x116   : > { %v593_v48 = vpop.f32.mrf.mxu0  ;;  %977 = vmatmul.mubr.f32.gmra.mxu1 %v736_v0 }
 0x117   : > { %v739_v49 = vmax.f32 %v590_v47, 0.0  ;;  %v594_v51 = vadd.f32 %v593_v48, %v2487_v43 }
 0x118   : > { %v595_v52 = vpop.f32.mrf.mxu0 }
 0x119   : > { %v596_v53 = vadd.f32 %v595_v52, %v2490_v44  ;;  %982 = vmatprep.mubr.f32.mxu1 %v739_v49  ;;  %v740_v56 = vmax.f32 %v594_v51, 0.0 }
 0x11a   : > { %v599_v54 = vpop.f32.mrf.mxu0  ;;  %983 = vmatmul.mubr.f32.gmra.mxu1 %v738_v50 }
 0x11b   : > { %v741_v55 = vmax.f32 %v596_v53, 0.0  ;;  %v600_v57 = vadd.f32 %v599_v54, %v2487_v43 }
 0x11c   : > { %v601_v58 = vpop.f32.mrf.mxu0 }
 0x11d   : > { %v602_v59 = vadd.f32 %v601_v58, %v2490_v44  ;;  %988 = vmatprep.mubr.f32.mxu1 %v741_v55  ;;  %v742_v62 = vmax.f32 %v600_v57, 0.0 }
 0x11e   : > { %v605_v60 = vpop.f32.mrf.mxu0  ;;  %989 = vmatmul.mubr.f32.gmra.mxu1 %v740_v56 }
 0x11f   : > { %v743_v61 = vmax.f32 %v602_v59, 0.0  ;;  %v606_v63 = vadd.f32 %v605_v60, %v2487_v43 }
 0x120   : > { %v607_v1 = vpop.f32.mrf.mxu0 }
 0x121   : > { %v608_v2 = vadd.f32 %v607_v1, %v2490_v44  ;;  %994 = vmatprep.mubr.f32.mxu1 %v743_v61  ;;  %v744_v5 = vmax.f32 %v606_v63, 0.0 }
 0x122   : > { %v611_v3 = vpop.f32.mrf.mxu0  ;;  %995 = vmatmul.mubr.f32.gmra.mxu1 %v742_v62 }
 0x123   : > { %v745_v4 = vmax.f32 %v608_v2, 0.0  ;;  %v612_v6 = vadd.f32 %v611_v3, %v2487_v43 }
 0x124   : > { %v613_v7 = vpop.f32.mrf.mxu0 }
 0x125   : > { %v614_v8 = vadd.f32 %v613_v7, %v2490_v44  ;;  %1000 = vmatprep.mubr.f32.mxu1 %v745_v4  ;;  %v746_v11 = vmax.f32 %v612_v6, 0.0 }
 0x126   : > { %v617_v9 = vpop.f32.mrf.mxu0  ;;  %1001 = vmatmul.mubr.f32.gmra.mxu1 %v744_v5 }
 0x127   : > { %v747_v10 = vmax.f32 %v614_v8, 0.0  ;;  %v618_v12 = vadd.f32 %v617_v9, %v2487_v43 }
 0x128   : > { %v619_v13 = vpop.f32.mrf.mxu0 }
 0x129   : > { %v620_v14 = vadd.f32 %v619_v13, %v2490_v44  ;;  %1006 = vmatprep.mubr.f32.mxu1 %v747_v10  ;;  %v748_v17 = vmax.f32 %v618_v12, 0.0 }
 0x12a   : > { %v623_v15 = vpop.f32.mrf.mxu0  ;;  %1007 = vmatmul.mubr.f32.gmra.mxu1 %v746_v11 }
 0x12b   : > { %v749_v16 = vmax.f32 %v620_v14, 0.0  ;;  %v624_v18 = vadd.f32 %v623_v15, %v2487_v43 }
 0x12c   : > { %v625_v19 = vpop.f32.mrf.mxu0 }
 0x12d   : > { %v626_v20 = vadd.f32 %v625_v19, %v2490_v44  ;;  %1012 = vmatprep.mubr.f32.mxu1 %v749_v16  ;;  %v750_v23 = vmax.f32 %v624_v18, 0.0 }
 0x12e   : > { %v629_v21 = vpop.f32.mrf.mxu0  ;;  %1013 = vmatmul.mubr.f32.gmra.mxu1 %v748_v17 }
 0x12f   : > { %v751_v22 = vmax.f32 %v626_v20, 0.0  ;;  %v630_v24 = vadd.f32 %v629_v21, %v2487_v43 }
 0x130   : > { %v631_v25 = vpop.f32.mrf.mxu0 }
 0x131   : > { %v632_v26 = vadd.f32 %v631_v25, %v2490_v44  ;;  %1018 = vmatprep.mubr.f32.mxu1 %v751_v22  ;;  %v752_v29 = vmax.f32 %v630_v24, 0.0 }
 0x132   : > { %v635_v27 = vpop.f32.mrf.mxu0  ;;  %1019 = vmatmul.mubr.f32.gmra.mxu1 %v750_v23 }
 0x133   : > { %v753_v28 = vmax.f32 %v632_v26, 0.0  ;;  %v636_v30 = vadd.f32 %v635_v27, %v2487_v43 }
 0x134   : > { %v637_v31 = vpop.f32.mrf.mxu0 }
 0x135   : > { %v638_v32 = vadd.f32 %v637_v31, %v2490_v44  ;;  %1024 = vmatprep.mubr.f32.mxu1 %v753_v28  ;;  %v754_v35 = vmax.f32 %v636_v30, 0.0 }
 0x136   : > { %v641_v33 = vpop.f32.mrf.mxu0  ;;  %1025 = vmatmul.mubr.f32.gmra.mxu1 %v752_v29 }
 0x137   : > { %v755_v34 = vmax.f32 %v638_v32, 0.0  ;;  %v642_v36 = vadd.f32 %v641_v33, %v2487_v43 }
 0x138   : > { %v643_v37 = vpop.f32.mrf.mxu0 }
 0x139   : > { %v644_v38 = vadd.f32 %v643_v37, %v2490_v44  ;;  %1030 = vmatprep.mubr.f32.mxu1 %v755_v34  ;;  %v756_v0 = vmax.f32 %v642_v36, 0.0 }
 0x13a   : > { %v647_v39 = vpop.f32.mrf.mxu0  ;;  %1031 = vmatmul.mubr.f32.gmra.mxu1 %v754_v35 }
 0x13b   : > { %v757_v41 = vmax.f32 %v644_v38, 0.0  ;;  %v648_v45 = vadd.f32 %v647_v39, %v2487_v43 }
 0x13c   : > { %v649_v46 = vpop.f32.mrf.mxu0 }
 0x13d   : > { %v650_v47 = vadd.f32 %v649_v46, %v2490_v44  ;;  %1036 = vmatprep.mubr.f32.mxu1 %v757_v41  ;;  %v758_v50 = vmax.f32 %v648_v45, 0.0 }
 0x13e   : > { %v653_v48 = vpop.f32.mrf.mxu0  ;;  %1037 = vmatmul.mubr.f32.gmra.mxu1 %v756_v0 }
 0x13f   : > { %v759_v49 = vmax.f32 %v650_v47, 0.0  ;;  %v654_v51 = vadd.f32 %v653_v48, %v2487_v43 }
 0x140   : > { %v655_v52 = vpop.f32.mrf.mxu0 }
 0x141   : > { %v656_v53 = vadd.f32 %v655_v52, %v2490_v44  ;;  %1042 = vmatprep.mubr.f32.mxu1 %v759_v49  ;;  %v760_v56 = vmax.f32 %v654_v51, 0.0 }
 0x142   : > { %v659_v54 = vpop.f32.mrf.mxu0  ;;  %1043 = vmatmul.mubr.f32.gmra.mxu1 %v758_v50 }
 0x143   : > { %v761_v55 = vmax.f32 %v656_v53, 0.0  ;;  %v660_v57 = vadd.f32 %v659_v54, %v2487_v43 }
 0x144   : > { %v661_v58 = vpop.f32.mrf.mxu0 }
 0x145   : > { %v662_v59 = vadd.f32 %v661_v58, %v2490_v44  ;;  %1048 = vmatprep.mubr.f32.mxu1 %v761_v55  ;;  %v762_v62 = vmax.f32 %v660_v57, 0.0 }
 0x146   : > { %v665_v60 = vpop.f32.mrf.mxu0  ;;  %1049 = vmatmul.mubr.f32.gmra.mxu1 %v760_v56  ;;  %v846_v56 = vld [vmem:[%s2946_s4] sm:$0x3] }
 0x147   : > { %v763_v61 = vmax.f32 %v662_v59, 0.0  ;;  %v666_v63 = vadd.f32 %v665_v60, %v2487_v43  ;;  %v2560_v57 = vrot.slane %v846_v56, %v2479_v40  ;;  %v2563_v58 = vrot.slane %v846_v56, %v2484_v42 }
 0x148   : > { %v667_v1 = vpop.f32.mrf.mxu0 }
 0x149   : > { %v668_v2 = vadd.f32 %v667_v1, %v2490_v44  ;;  %1054 = vmatprep.mubr.f32.mxu1 %v763_v61  ;;  %v764_v5 = vmax.f32 %v666_v63, 0.0 }
 0x14a   : > { %v671_v3 = vpop.f32.mrf.mxu0  ;;  %1055 = vmatmul.mubr.f32.gmra.mxu1 %v762_v62 }
 0x14b   : > { %v765_v4 = vmax.f32 %v668_v2, 0.0  ;;  %v672_v6 = vadd.f32 %v671_v3, %v2487_v43 }
 0x14c   : > { %v673_v7 = vpop.f32.mrf.mxu0 }
 0x14d   : > { %v674_v8 = vadd.f32 %v673_v7, %v2490_v44  ;;  %1060 = vmatprep.mubr.f32.mxu1 %v765_v4  ;;  %v766_v11 = vmax.f32 %v672_v6, 0.0 }
 0x14e   : > { %v677_v9 = vpop.f32.mrf.mxu0  ;;  %1061 = vmatmul.mubr.f32.gmra.mxu1 %v764_v5 }
 0x14f   : > { %v767_v10 = vmax.f32 %v674_v8, 0.0  ;;  %v678_v12 = vadd.f32 %v677_v9, %v2487_v43 }
 0x150   : > { %v679_v13 = vpop.f32.mrf.mxu0 }
 0x151   : > { %v680_v14 = vadd.f32 %v679_v13, %v2490_v44  ;;  %1066 = vmatprep.mubr.f32.mxu1 %v767_v10  ;;  %v768_v17 = vmax.f32 %v678_v12, 0.0 }
 0x152   : > { %v683_v15 = vpop.f32.mrf.mxu0  ;;  %1067 = vmatmul.mubr.f32.gmra.mxu1 %v766_v11 }
 0x153   : > { %v769_v16 = vmax.f32 %v680_v14, 0.0  ;;  %v684_v18 = vadd.f32 %v683_v15, %v2487_v43 }
 0x154   : > { %v685_v19 = vpop.f32.mrf.mxu0 }
 0x155   : > { %v686_v20 = vadd.f32 %v685_v19, %v2490_v44  ;;  %1072 = vmatprep.mubr.f32.mxu1 %v769_v16  ;;  %v770_v23 = vmax.f32 %v684_v18, 0.0 }
 0x156   : > { %v689_v21 = vpop.f32.mrf.mxu0  ;;  %1073 = vmatmul.mubr.f32.gmra.mxu1 %v768_v17 }
 0x157   : > { %v771_v22 = vmax.f32 %v686_v20, 0.0  ;;  %v690_v24 = vadd.f32 %v689_v21, %v2487_v43 }
 0x158   : > { %v691_v25 = vpop.f32.mrf.mxu0 }
 0x159   : > { %v692_v26 = vadd.f32 %v691_v25, %v2490_v44  ;;  %1078 = vmatprep.mubr.f32.mxu1 %v771_v22  ;;  %v772_v29 = vmax.f32 %v690_v24, 0.0 }
 0x15a   : > { %v695_v27 = vpop.f32.mrf.mxu0  ;;  %1079 = vmatmul.mubr.f32.gmra.mxu1 %v770_v23 }
 0x15b   : > { %v773_v28 = vmax.f32 %v692_v26, 0.0  ;;  %v696_v30 = vadd.f32 %v695_v27, %v2487_v43 }
 0x15c   : > { %v697_v31 = vpop.f32.mrf.mxu0 }
 0x15d   : > { %v698_v32 = vadd.f32 %v697_v31, %v2490_v44  ;;  %1084 = vmatprep.mubr.f32.mxu1 %v773_v28  ;;  %v774_v35 = vmax.f32 %v696_v30, 0.0 }
 0x15e   : > { %v701_v33 = vpop.f32.mrf.mxu0  ;;  %1085 = vmatmul.mubr.f32.gmra.mxu1 %v772_v29 }
 0x15f   : > { %v775_v34 = vmax.f32 %v698_v32, 0.0  ;;  %v702_v36 = vadd.f32 %v701_v33, %v2487_v43 }
 0x160   : > { %v703_v37 = vpop.f32.mrf.mxu0 }
 0x161   : > { %v704_v38 = vadd.f32 %v703_v37, %v2490_v44  ;;  %1090 = vmatprep.mubr.f32.mxu1 %v775_v34  ;;  %v776_v0 = vmax.f32 %v702_v36, 0.0 }
 0x162   : > { %v707_v39 = vpop.f32.mrf.mxu0  ;;  %1091 = vmatmul.mubr.f32.gmra.mxu1 %v774_v35 }
 0x163   : > { %v777_v41 = vmax.f32 %v704_v38, 0.0  ;;  %v708_v45 = vadd.f32 %v707_v39, %v2487_v43 }
 0x164   : > { %v709_v46 = vpop.f32.mrf.mxu0 }
 0x165   : > { %v710_v47 = vadd.f32 %v709_v46, %v2490_v44  ;;  %1096 = vmatprep.mubr.f32.mxu1 %v777_v41  ;;  %v778_v50 = vmax.f32 %v708_v45, 0.0 }
 0x166   : > { %v713_v48 = vpop.f32.mrf.mxu0  ;;  %1097 = vmatmul.mubr.f32.gmra.mxu1 %v776_v0 }
 0x167   : > { %v779_v49 = vmax.f32 %v710_v47, 0.0  ;;  %v714_v51 = vadd.f32 %v713_v48, %v2487_v43 }
 0x168   : > { %v715_v52 = vpop.f32.mrf.mxu0 }
 0x169   : > { %v716_v53 = vadd.f32 %v715_v52, %v2490_v44  ;;  %1102 = vmatprep.mubr.f32.mxu1 %v779_v49  ;;  %v780_v55 = vmax.f32 %v714_v51, 0.0  ;;  %v1179_v44 = vld [vmem:[%s2947_s5] sm:$0x3] }
 0x16a   : > { %1103 = vmatmul.mubr.f32.gmra.mxu1 %v778_v50  ;;  %v2571_v63 = vrot.slane %v1179_v44, %v2479_v40  ;;  %v2574_v1 = vrot.slane %v1179_v44, %v2484_v42 }
 0x16b   : > { %v781_v54 = vmax.f32 %v716_v53, 0.0 }
 0x16d   : > { %1108 = vmatprep.mubr.f32.mxu1 %v781_v54 }
 0x16e   : > { %1109 = vmatmul.mubr.f32.gmra.mxu1 %v780_v55 }
 0x1b2   : > { %v924_v43 = vpop.f32.mrf.mxu0 }
 0x1b3   : > { %v925_v59 = vadd.f32 %v924_v43, %v2560_v57 }
 0x1b4   : > { %v926_v60 = vpop.f32.mrf.mxu0 }
 0x1b5   : > { %v1115_v61 = vmax.f32 %v925_v59, 0.0  ;;  %v927_v62 = vadd.f32 %v926_v60, %v2563_v58 }
 0x1b6   : > { %v930_v2 = vpop.f32.mrf.mxu0 }
 0x1b7   : > { %v1116_v3 = vmax.f32 %v927_v62, 0.0  ;;  %v931_v4 = vadd.f32 %v930_v2, %v2560_v57  ;;  %v1191_v8 = vmul.f32 %v2571_v63, %v1115_v61 }
 0x1b8   : > { %v932_v5 = vpop.f32.mrf.mxu0 }
 0x1b9   : > { %v1117_v6 = vmax.f32 %v931_v4, 0.0  ;;  %v933_v7 = vadd.f32 %v932_v5, %v2563_v58  ;;  %v1192_v9 = vmul.f32 %v2574_v1, %v1116_v3 }
 0x1ba   : > { %v936_v10 = vpop.f32.mrf.mxu0 }
 0x1bb   : > { %v1118_v11 = vmax.f32 %v933_v7, 0.0  ;;  %v937_v40 = vadd.f32 %v936_v10, %v2560_v57  ;;  %v1255_v12 = vadd.f32 %v1192_v9, %v1191_v8  ;;  %v1193_v42 = vmul.f32 %v2571_v63, %v1117_v6 }
 0x1bc   : > { %v938_v13 = vpop.f32.mrf.mxu0 }
 0x1bd   : > { %v1194_v14 = vmul.f32 %v2574_v1, %v1118_v11  ;;  %v1119_v15 = vmax.f32 %v937_v40, 0.0  ;;  %v939_v16 = vadd.f32 %v938_v13, %v2563_v58  ;;  %1256 = vadd.xlane.f32.xlu0 %v1255_v12 }
 0x1be   : > { %v942_v17 = vpop.f32.mrf.mxu0 }
 0x1bf   : > { %v1120_v18 = vmax.f32 %v939_v16, 0.0  ;;  %v943_v19 = vadd.f32 %v942_v17, %v2560_v57  ;;  %v1258_v20 = vadd.f32 %v1194_v14, %v1193_v42  ;;  %v1195_v24 = vmul.f32 %v2571_v63, %v1119_v15 }
 0x1c0   : > { %v944_v21 = vpop.f32.mrf.mxu0 }
 0x1c1   : > { %v1121_v22 = vmax.f32 %v943_v19, 0.0  ;;  %v945_v23 = vadd.f32 %v944_v21, %v2563_v58  ;;  %1259 = vadd.xlane.f32.xlu0 %v1258_v20  ;;  %v1196_v25 = vmul.f32 %v2574_v1, %v1120_v18 }
 0x1c2   : > { %v948_v26 = vpop.f32.mrf.mxu0 }
 0x1c3   : > { %v1122_v27 = vmax.f32 %v945_v23, 0.0  ;;  %v949_v28 = vadd.f32 %v948_v26, %v2560_v57  ;;  %v1261_v29 = vadd.f32 %v1196_v25, %v1195_v24  ;;  %v1197_v31 = vmul.f32 %v2571_v63, %v1121_v22 }
 0x1c4   : > { %v950_v30 = vpop.f32.mrf.mxu0 }
 0x1c5   : > { %v1198_v32 = vmul.f32 %v2574_v1, %v1122_v27  ;;  %v1123_v33 = vmax.f32 %v949_v28, 0.0  ;;  %v951_v34 = vadd.f32 %v950_v30, %v2563_v58  ;;  %1262 = vadd.xlane.f32.xlu1 %v1261_v29 }
 0x1c6   : > { %v954_v35 = vpop.f32.mrf.mxu0 }
 0x1c7   : > { %v1124_v36 = vmax.f32 %v951_v34, 0.0  ;;  %v955_v37 = vadd.f32 %v954_v35, %v2560_v57  ;;  %v1264_v38 = vadd.f32 %v1198_v32, %v1197_v31  ;;  %v1199_v41 = vmul.f32 %v2571_v63, %v1123_v33 }
 0x1c8   : > { %v956_v39 = vpop.f32.mrf.mxu0 }
 0x1c9   : > { %v1200_v0 = vmul.f32 %v2574_v1, %v1124_v36  ;;  %v1125_v45 = vmax.f32 %v955_v37, 0.0  ;;  %v957_v46 = vadd.f32 %v956_v39, %v2563_v58  ;;  %1265 = vadd.xlane.f32.xlu1 %v1264_v38 }
 0x1ca   : > { %v960_v47 = vpop.f32.mrf.mxu0 }
 0x1cb   : > { %v1126_v48 = vmax.f32 %v957_v46, 0.0  ;;  %v961_v49 = vadd.f32 %v960_v47, %v2560_v57  ;;  %v1267_v50 = vadd.f32 %v1200_v0, %v1199_v41  ;;  %v1201_v52 = vmul.f32 %v2571_v63, %v1125_v45 }
 0x1cc   : > { %v962_v51 = vpop.f32.mrf.mxu0 }
 0x1cd   : > { %v1202_v53 = vmul.f32 %v2574_v1, %v1126_v48  ;;  %v1127_v54 = vmax.f32 %v961_v49, 0.0  ;;  %v963_v55 = vadd.f32 %v962_v51, %v2563_v58  ;;  %1268 = vadd.xlane.f32.xlu0 %v1267_v50 }
 0x1ce   : > { %v966_v56 = vpop.f32.mrf.mxu1 }
 0x1cf   : > { %v1128_v43 = vmax.f32 %v963_v55, 0.0  ;;  %v967_v44 = vadd.f32 %v966_v56, %v2560_v57  ;;  %v1270_v59 = vadd.f32 %v1202_v53, %v1201_v52  ;;  %v1203_v61 = vmul.f32 %v2571_v63, %v1127_v54 }
 0x1d0   : > { %v968_v60 = vpop.f32.mrf.mxu1 }
 0x1d1   : > { %v1204_v62 = vmul.f32 %v2574_v1, %v1128_v43  ;;  %v1129_v2 = vmax.f32 %v967_v44, 0.0  ;;  %v969_v3 = vadd.f32 %v968_v60, %v2563_v58  ;;  %1271 = vadd.xlane.f32.xlu1 %v1270_v59 }
 0x1d2   : > { %v972_v4 = vpop.f32.mrf.mxu1 }
 0x1d3   : > { %v1130_v5 = vmax.f32 %v969_v3, 0.0  ;;  %v973_v6 = vadd.f32 %v972_v4, %v2560_v57  ;;  %v1273_v7 = vadd.f32 %v1204_v62, %v1203_v61  ;;  %v1205_v9 = vmul.f32 %v2571_v63, %v1129_v2 }
 0x1d4   : > { %v974_v8 = vpop.f32.mrf.mxu1 }
 0x1d5   : > { %v1206_v10 = vmul.f32 %v2574_v1, %v1130_v5  ;;  %v1131_v11 = vmax.f32 %v973_v6, 0.0  ;;  %v975_v40 = vadd.f32 %v974_v8, %v2563_v58  ;;  %1274 = vadd.xlane.f32.xlu0 %v1273_v7 }
 0x1d6   : > { %v978_v12 = vpop.f32.mrf.mxu1 }
 0x1d7   : > { %v1132_v13 = vmax.f32 %v975_v40, 0.0  ;;  %v979_v42 = vadd.f32 %v978_v12, %v2560_v57  ;;  %v1276_v14 = vadd.f32 %v1206_v10, %v1205_v9  ;;  %v1207_v16 = vmul.f32 %v2571_v63, %v1131_v11 }
 0x1d8   : > { %v980_v15 = vpop.f32.mrf.mxu1 }
 0x1d9   : > { %v1208_v17 = vmul.f32 %v2574_v1, %v1132_v13  ;;  %v1133_v18 = vmax.f32 %v979_v42, 0.0  ;;  %v981_v19 = vadd.f32 %v980_v15, %v2563_v58  ;;  %1277 = vadd.xlane.f32.xlu1 %v1276_v14 }
 0x1da   : > { %v984_v20 = vpop.f32.mrf.mxu1 }
 0x1db   : > { %v1134_v21 = vmax.f32 %v981_v19, 0.0  ;;  %v985_v22 = vadd.f32 %v984_v20, %v2560_v57  ;;  %v1279_v23 = vadd.f32 %v1208_v17, %v1207_v16  ;;  %v1209_v25 = vmul.f32 %v2571_v63, %v1133_v18 }
 0x1dc   : > { %v986_v24 = vpop.f32.mrf.mxu1 }
 0x1dd   : > { %v1210_v26 = vmul.f32 %v2574_v1, %v1134_v21  ;;  %v1135_v27 = vmax.f32 %v985_v22, 0.0  ;;  %v987_v28 = vadd.f32 %v986_v24, %v2563_v58  ;;  %1280 = vadd.xlane.f32.xlu0 %v1279_v23 }
 0x1de   : > { %v990_v29 = vpop.f32.mrf.mxu1 }
 0x1df   : > { %v1136_v30 = vmax.f32 %v987_v28, 0.0  ;;  %v991_v31 = vadd.f32 %v990_v29, %v2560_v57  ;;  %v1282_v32 = vadd.f32 %v1210_v26, %v1209_v25  ;;  %v1211_v34 = vmul.f32 %v2571_v63, %v1135_v27 }
 0x1e0   : > { %v992_v33 = vpop.f32.mrf.mxu1 }
 0x1e1   : > { %v1212_v35 = vmul.f32 %v2574_v1, %v1136_v30  ;;  %v1137_v36 = vmax.f32 %v991_v31, 0.0  ;;  %v993_v37 = vadd.f32 %v992_v33, %v2563_v58  ;;  %1283 = vadd.xlane.f32.xlu1 %v1282_v32 }
 0x1e2   : > { %v996_v38 = vpop.f32.mrf.mxu1 }
 0x1e3   : > { %v1138_v39 = vmax.f32 %v993_v37, 0.0  ;;  %v997_v41 = vadd.f32 %v996_v38, %v2560_v57  ;;  %v1285_v0 = vadd.f32 %v1212_v35, %v1211_v34  ;;  %v1213_v46 = vmul.f32 %v2571_v63, %v1137_v36 }
 0x1e4   : > { %v998_v45 = vpop.f32.mrf.mxu1 }
 0x1e5   : > { %v1214_v47 = vmul.f32 %v2574_v1, %v1138_v39  ;;  %v1139_v48 = vmax.f32 %v997_v41, 0.0  ;;  %v999_v49 = vadd.f32 %v998_v45, %v2563_v58  ;;  %1286 = vadd.xlane.f32.xlu0 %v1285_v0 }
 0x1e6   : > { %v1002_v50 = vpop.f32.mrf.mxu1 }
 0x1e7   : > { %v1140_v51 = vmax.f32 %v999_v49, 0.0  ;;  %v1003_v52 = vadd.f32 %v1002_v50, %v2560_v57  ;;  %v1288_v53 = vadd.f32 %v1214_v47, %v1213_v46  ;;  %v1215_v55 = vmul.f32 %v2571_v63, %v1139_v48 }
 0x1e8   : > { %v1004_v54 = vpop.f32.mrf.mxu1 }
 0x1e9   : > { %v1216_v56 = vmul.f32 %v2574_v1, %v1140_v51  ;;  %v1141_v43 = vmax.f32 %v1003_v52, 0.0  ;;  %v1005_v44 = vadd.f32 %v1004_v54, %v2563_v58  ;;  %1289 = vadd.xlane.f32.xlu1 %v1288_v53 }
 0x1ea   : > { %v1008_v59 = vpop.f32.mrf.mxu1 }
 0x1eb   : > { %v1142_v60 = vmax.f32 %v1005_v44, 0.0  ;;  %v1009_v61 = vadd.f32 %v1008_v59, %v2560_v57  ;;  %v1291_v62 = vadd.f32 %v1216_v56, %v1215_v55  ;;  %v1217_v3 = vmul.f32 %v2571_v63, %v1141_v43 }
 0x1ec   : > { %v1010_v2 = vpop.f32.mrf.mxu1 }
 0x1ed   : > { %v1218_v4 = vmul.f32 %v2574_v1, %v1142_v60  ;;  %v1143_v5 = vmax.f32 %v1009_v61, 0.0  ;;  %v1011_v6 = vadd.f32 %v1010_v2, %v2563_v58  ;;  %1292 = vadd.xlane.f32.xlu0 %v1291_v62 }
 0x1ee   : > { %v1014_v7 = vpop.f32.mrf.mxu1 }
 0x1ef   : > { %v1144_v8 = vmax.f32 %v1011_v6, 0.0  ;;  %v1015_v9 = vadd.f32 %v1014_v7, %v2560_v57  ;;  %v1294_v10 = vadd.f32 %v1218_v4, %v1217_v3  ;;  %v1219_v40 = vmul.f32 %v2571_v63, %v1143_v5 }
 0x1f0   : > { %v1016_v11 = vpop.f32.mrf.mxu1 }
 0x1f1   : > { %v1220_v12 = vmul.f32 %v2574_v1, %v1144_v8  ;;  %v1145_v13 = vmax.f32 %v1015_v9, 0.0  ;;  %v1017_v42 = vadd.f32 %v1016_v11, %v2563_v58  ;;  %1295 = vadd.xlane.f32.xlu1 %v1294_v10 }
 0x1f2   : > { %v1020_v14 = vpop.f32.mrf.mxu1 }
 0x1f3   : > { %v1146_v15 = vmax.f32 %v1017_v42, 0.0  ;;  %v1021_v16 = vadd.f32 %v1020_v14, %v2560_v57  ;;  %v1297_v17 = vadd.f32 %v1220_v12, %v1219_v40  ;;  %v1221_v19 = vmul.f32 %v2571_v63, %v1145_v13 }
 0x1f4   : > { %v1022_v18 = vpop.f32.mrf.mxu1 }
 0x1f5   : > { %v1222_v20 = vmul.f32 %v2574_v1, %v1146_v15  ;;  %v1147_v21 = vmax.f32 %v1021_v16, 0.0  ;;  %v1023_v22 = vadd.f32 %v1022_v18, %v2563_v58  ;;  %1298 = vadd.xlane.f32.xlu0 %v1297_v17 }
 0x1f6   : > { %v1026_v23 = vpop.f32.mrf.mxu1 }
 0x1f7   : > { %v1148_v24 = vmax.f32 %v1023_v22, 0.0  ;;  %v1027_v25 = vadd.f32 %v1026_v23, %v2560_v57  ;;  %v1300_v26 = vadd.f32 %v1222_v20, %v1221_v19  ;;  %v1223_v28 = vmul.f32 %v2571_v63, %v1147_v21 }
 0x1f8   : > { %v1028_v27 = vpop.f32.mrf.mxu1 }
 0x1f9   : > { %v1224_v29 = vmul.f32 %v2574_v1, %v1148_v24  ;;  %v1149_v30 = vmax.f32 %v1027_v25, 0.0  ;;  %v1029_v31 = vadd.f32 %v1028_v27, %v2563_v58  ;;  %1301 = vadd.xlane.f32.xlu1 %v1300_v26 }
 0x1fa   : > { %v1032_v32 = vpop.f32.mrf.mxu1 }
 0x1fb   : > { %v1150_v33 = vmax.f32 %v1029_v31, 0.0  ;;  %v1033_v34 = vadd.f32 %v1032_v32, %v2560_v57  ;;  %v1303_v35 = vadd.f32 %v1224_v29, %v1223_v28  ;;  %v1225_v37 = vmul.f32 %v2571_v63, %v1149_v30 }
 0x1fc   : > { %v1034_v36 = vpop.f32.mrf.mxu1 }
 0x1fd   : > { %v1226_v38 = vmul.f32 %v2574_v1, %v1150_v33  ;;  %v1151_v39 = vmax.f32 %v1033_v34, 0.0  ;;  %v1035_v41 = vadd.f32 %v1034_v36, %v2563_v58  ;;  %1304 = vadd.xlane.f32.xlu0 %v1303_v35 }
 0x1fe   : > { %v1038_v0 = vpop.f32.mrf.mxu1 }
 0x1ff   : > { %v1152_v45 = vmax.f32 %v1035_v41, 0.0  ;;  %v1039_v46 = vadd.f32 %v1038_v0, %v2560_v57  ;;  %v1306_v47 = vadd.f32 %v1226_v38, %v1225_v37  ;;  %v1227_v49 = vmul.f32 %v2571_v63, %v1151_v39 }
 0x200   : > { %v1040_v48 = vpop.f32.mrf.mxu1 }
 0x201   : > { %v1228_v50 = vmul.f32 %v2574_v1, %v1152_v45  ;;  %v1153_v51 = vmax.f32 %v1039_v46, 0.0  ;;  %v1041_v52 = vadd.f32 %v1040_v48, %v2563_v58  ;;  %1307 = vadd.xlane.f32.xlu1 %v1306_v47 }
 0x202   : > { %v1044_v53 = vpop.f32.mrf.mxu1 }
 0x203   : > { %v1154_v54 = vmax.f32 %v1041_v52, 0.0  ;;  %v1045_v55 = vadd.f32 %v1044_v53, %v2560_v57  ;;  %v1309_v56 = vadd.f32 %v1228_v50, %v1227_v49  ;;  %v1229_v44 = vmul.f32 %v2571_v63, %v1153_v51 }
 0x204   : > { %v1046_v43 = vpop.f32.mrf.mxu1 }
 0x205   : > { %v1230_v59 = vmul.f32 %v2574_v1, %v1154_v54  ;;  %v1155_v60 = vmax.f32 %v1045_v55, 0.0  ;;  %v1047_v61 = vadd.f32 %v1046_v43, %v2563_v58  ;;  %1310 = vadd.xlane.f32.xlu0 %v1309_v56 }
 0x206   : > { %v1050_v62 = vpop.f32.mrf.mxu1 }
 0x207   : > { %v1156_v2 = vmax.f32 %v1047_v61, 0.0  ;;  %v1051_v3 = vadd.f32 %v1050_v62, %v2560_v57  ;;  %v1312_v4 = vadd.f32 %v1230_v59, %v1229_v44  ;;  %v1231_v6 = vmul.f32 %v2571_v63, %v1155_v60 }
 0x208   : > { %v1052_v5 = vpop.f32.mrf.mxu1 }
 0x209   : > { %v1232_v7 = vmul.f32 %v2574_v1, %v1156_v2  ;;  %v1157_v8 = vmax.f32 %v1051_v3, 0.0  ;;  %v1053_v9 = vadd.f32 %v1052_v5, %v2563_v58  ;;  %1313 = vadd.xlane.f32.xlu1 %v1312_v4 }
 0x20a   : > { %v1056_v10 = vpop.f32.mrf.mxu1 }
 0x20b   : > { %v1158_v11 = vmax.f32 %v1053_v9, 0.0  ;;  %v1057_v40 = vadd.f32 %v1056_v10, %v2560_v57  ;;  %v1315_v12 = vadd.f32 %v1232_v7, %v1231_v6  ;;  %v1233_v42 = vmul.f32 %v2571_v63, %v1157_v8 }
 0x20c   : > { %v1058_v13 = vpop.f32.mrf.mxu1 }
 0x20d   : > { %v1234_v14 = vmul.f32 %v2574_v1, %v1158_v11  ;;  %v1159_v15 = vmax.f32 %v1057_v40, 0.0  ;;  %v1059_v16 = vadd.f32 %v1058_v13, %v2563_v58  ;;  %1316 = vadd.xlane.f32.xlu0 %v1315_v12 }
 0x20e   : > { %v1062_v17 = vpop.f32.mrf.mxu1 }
 0x20f   : > { %v1160_v18 = vmax.f32 %v1059_v16, 0.0  ;;  %v1063_v19 = vadd.f32 %v1062_v17, %v2560_v57  ;;  %v1318_v20 = vadd.f32 %v1234_v14, %v1233_v42  ;;  %v1235_v22 = vmul.f32 %v2571_v63, %v1159_v15 }
 0x210   : > { %v1064_v21 = vpop.f32.mrf.mxu1 }
 0x211   : > { %v1236_v23 = vmul.f32 %v2574_v1, %v1160_v18  ;;  %v1161_v24 = vmax.f32 %v1063_v19, 0.0  ;;  %v1065_v25 = vadd.f32 %v1064_v21, %v2563_v58  ;;  %1319 = vadd.xlane.f32.xlu1 %v1318_v20 }
 0x212   : > { %v1068_v26 = vpop.f32.mrf.mxu1 }
 0x213   : > { %v1162_v27 = vmax.f32 %v1065_v25, 0.0  ;;  %v1069_v28 = vadd.f32 %v1068_v26, %v2560_v57  ;;  %v1321_v29 = vadd.f32 %v1236_v23, %v1235_v22  ;;  %v1237_v31 = vmul.f32 %v2571_v63, %v1161_v24 }
 0x214   : > { %v1070_v30 = vpop.f32.mrf.mxu1 }
 0x215   : > { %v1238_v32 = vmul.f32 %v2574_v1, %v1162_v27  ;;  %v1163_v33 = vmax.f32 %v1069_v28, 0.0  ;;  %v1071_v34 = vadd.f32 %v1070_v30, %v2563_v58  ;;  %1322 = vadd.xlane.f32.xlu0 %v1321_v29 }
 0x216   : > { %v1074_v35 = vpop.f32.mrf.mxu1 }
 0x217   : > { %v1164_v36 = vmax.f32 %v1071_v34, 0.0  ;;  %v1075_v37 = vadd.f32 %v1074_v35, %v2560_v57  ;;  %v1324_v38 = vadd.f32 %v1238_v32, %v1237_v31  ;;  %v1239_v41 = vmul.f32 %v2571_v63, %v1163_v33 }
 0x218   : > { %v1076_v39 = vpop.f32.mrf.mxu1 }
 0x219   : > { %v1240_v0 = vmul.f32 %v2574_v1, %v1164_v36  ;;  %v1165_v45 = vmax.f32 %v1075_v37, 0.0  ;;  %v1077_v46 = vadd.f32 %v1076_v39, %v2563_v58  ;;  %1325 = vadd.xlane.f32.xlu1 %v1324_v38 }
 0x21a   : > { %v1080_v47 = vpop.f32.mrf.mxu1 }
 0x21b   : > { %v1166_v48 = vmax.f32 %v1077_v46, 0.0  ;;  %v1081_v49 = vadd.f32 %v1080_v47, %v2560_v57  ;;  %v1327_v50 = vadd.f32 %v1240_v0, %v1239_v41  ;;  %v1241_v52 = vmul.f32 %v2571_v63, %v1165_v45 }
 0x21c   : > { %v1082_v51 = vpop.f32.mrf.mxu1 }
 0x21d   : > { %v1242_v53 = vmul.f32 %v2574_v1, %v1166_v48  ;;  %v1167_v54 = vmax.f32 %v1081_v49, 0.0  ;;  %v1083_v55 = vadd.f32 %v1082_v51, %v2563_v58  ;;  %1328 = vadd.xlane.f32.xlu0 %v1327_v50 }
 0x21e   : > { %v1086_v56 = vpop.f32.mrf.mxu1 }
 0x21f   : > { %v1168_v43 = vmax.f32 %v1083_v55, 0.0  ;;  %v1087_v44 = vadd.f32 %v1086_v56, %v2560_v57  ;;  %v1330_v59 = vadd.f32 %v1242_v53, %v1241_v52  ;;  %v1243_v61 = vmul.f32 %v2571_v63, %v1167_v54 }
 0x220   : > { %v1088_v60 = vpop.f32.mrf.mxu1 }
 0x221   : > { %v1244_v62 = vmul.f32 %v2574_v1, %v1168_v43  ;;  %v1169_v2 = vmax.f32 %v1087_v44, 0.0  ;;  %v1089_v3 = vadd.f32 %v1088_v60, %v2563_v58  ;;  %1331 = vadd.xlane.f32.xlu1 %v1330_v59 }
 0x222   : > { %v1092_v4 = vpop.f32.mrf.mxu1 }
 0x223   : > { %v1170_v5 = vmax.f32 %v1089_v3, 0.0  ;;  %v1093_v6 = vadd.f32 %v1092_v4, %v2560_v57  ;;  %v1333_v7 = vadd.f32 %v1244_v62, %v1243_v61  ;;  %v1245_v9 = vmul.f32 %v2571_v63, %v1169_v2 }
 0x224   : > { %v1094_v8 = vpop.f32.mrf.mxu1 }
 0x225   : > { %v1246_v10 = vmul.f32 %v2574_v1, %v1170_v5  ;;  %v1171_v11 = vmax.f32 %v1093_v6, 0.0  ;;  %v1095_v40 = vadd.f32 %v1094_v8, %v2563_v58  ;;  %1334 = vadd.xlane.f32.xlu0 %v1333_v7 }
 0x226   : > { %v1098_v12 = vpop.f32.mrf.mxu1 }
 0x227   : > { %v1172_v13 = vmax.f32 %v1095_v40, 0.0  ;;  %v1099_v42 = vadd.f32 %v1098_v12, %v2560_v57  ;;  %v1336_v14 = vadd.f32 %v1246_v10, %v1245_v9  ;;  %v1247_v16 = vmul.f32 %v2571_v63, %v1171_v11 }
 0x228   : > { %v1100_v15 = vpop.f32.mrf.mxu1 }
 0x229   : > { %v1248_v17 = vmul.f32 %v2574_v1, %v1172_v13  ;;  %v1173_v18 = vmax.f32 %v1099_v42, 0.0  ;;  %v1101_v19 = vadd.f32 %v1100_v15, %v2563_v58  ;;  %1337 = vadd.xlane.f32.xlu1 %v1336_v14 }
 0x22a   : > { %v1104_v20 = vpop.f32.mrf.mxu1 }
 0x22b   : > { %v1174_v21 = vmax.f32 %v1101_v19, 0.0  ;;  %v1105_v22 = vadd.f32 %v1104_v20, %v2560_v57  ;;  %v1339_v23 = vadd.f32 %v1248_v17, %v1247_v16  ;;  %v1249_v25 = vmul.f32 %v2571_v63, %v1173_v18 }
 0x22c   : > { %v1106_v24 = vpop.f32.mrf.mxu1 }
 0x22d   : > { %v1250_v26 = vmul.f32 %v2574_v1, %v1174_v21  ;;  %v1175_v27 = vmax.f32 %v1105_v22, 0.0  ;;  %v1107_v28 = vadd.f32 %v1106_v24, %v2563_v58  ;;  %1340 = vadd.xlane.f32.xlu0 %v1339_v23 }
 0x22e   : > { %v1110_v29 = vpop.f32.mrf.mxu1 }
 0x22f   : > { %v1176_v30 = vmax.f32 %v1107_v28, 0.0  ;;  %v1111_v31 = vadd.f32 %v1110_v29, %v2560_v57  ;;  %v1342_v32 = vadd.f32 %v1250_v26, %v1249_v25  ;;  %v1251_v34 = vmul.f32 %v2571_v63, %v1175_v27 }
 0x230   : > { %v1112_v33 = vpop.f32.mrf.mxu1  ;;  %v2703_v57 = vstv %s1351_s22 }
 0x231   : > { %v1252_v35 = vmul.f32 %v2574_v1, %v1176_v30  ;;  %v1177_v36 = vmax.f32 %v1111_v31, 0.0  ;;  %v1113_v37 = vadd.f32 %v1112_v33, %v2563_v58  ;;  %1343 = vadd.xlane.f32.xlu1 %v1342_v32 }
 0x233   : > { %v1178_v38 = vmax.f32 %v1113_v37, 0.0  ;;  %v1345_v39 = vadd.f32 %v1252_v35, %v1251_v34  ;;  %v1253_v41 = vmul.f32 %v2571_v63, %v1177_v36 }
 0x235   : > { %v1254_v0 = vmul.f32 %v2574_v1, %v1178_v38  ;;  %1346 = vadd.xlane.f32.xlu0 %v1345_v39 }
 0x237   : > { %v1348_v45 = vadd.f32 %v1254_v0, %v1253_v41 }
 0x239   : > { %1349 = vadd.xlane.f32.xlu1 %v1348_v45 }
 0x246   : > { %v1257_v46 = vpop.xlane.xlu0 %1256 }
 0x247   : > { %v1353_v47 = vadd.f32 %v2703_v57, %v1257_v46 }
 0x249   : > { %1386 = vst.msk [vmem:[%s2706_s25] sm:$0xff] %vm1385_vm1, %v1353_v47 }
 0x24a   : > { %v1260_v58 = vpop.xlane.xlu0 %1259 }
 0x24b   : > { %v1354_v63 = vadd.f32 %v2703_v57, %v1260_v58 }
 0x24d   : > { %1387 = vst.msk [vmem:[%s2706_s25 + $0x8] sm:$0xff] %vm1385_vm1, %v1354_v63 }
 0x24e   : > { %v1263_v1 = vpop.xlane.xlu1 %1262 }
 0x24f   : > { %v1355_v48 = vadd.f32 %v2703_v57, %v1263_v1 }
 0x251   : > { %1388 = vst.msk [vmem:[%s2706_s25 + $0x10] sm:$0xff] %vm1385_vm1, %v1355_v48 }
 0x252   : > { %v1266_v49 = vpop.xlane.xlu1 %1265 }
 0x253   : > { %v1356_v50 = vadd.f32 %v2703_v57, %v1266_v49 }
 0x255   : > { %1389 = vst.msk [vmem:[%s2706_s25 + $0x18] sm:$0xff] %vm1385_vm1, %v1356_v50 }
 0x256   : > { %v1269_v51 = vpop.xlane.xlu0 %1268 }
 0x257   : > { %v1357_v52 = vadd.f32 %v2703_v57, %v1269_v51 }
 0x259   : > { %1390 = vst.msk [vmem:[%s2706_s25 + $0x20] sm:$0xff] %vm1385_vm1, %v1357_v52 }
 0x25a   : > { %v1272_v53 = vpop.xlane.xlu1 %1271 }
 0x25b   : > { %v1358_v54 = vadd.f32 %v2703_v57, %v1272_v53 }
 0x25d   : > { %1391 = vst.msk [vmem:[%s2706_s25 + $0x28] sm:$0xff] %vm1385_vm1, %v1358_v54 }
 0x25e   : > { %v1275_v55 = vpop.xlane.xlu0 %1274 }
 0x25f   : > { %v1359_v56 = vadd.f32 %v2703_v57, %v1275_v55 }
 0x261   : > { %1392 = vst.msk [vmem:[%s2706_s25 + $0x30] sm:$0xff] %vm1385_vm1, %v1359_v56 }
 0x262   : > { %v1278_v43 = vpop.xlane.xlu1 %1277 }
 0x263   : > { %v1360_v44 = vadd.f32 %v2703_v57, %v1278_v43 }
 0x265   : > { %1393 = vst.msk [vmem:[%s2706_s25 + $0x38] sm:$0xff] %vm1385_vm1, %v1360_v44 }
 0x266   : > { %v1281_v59 = vpop.xlane.xlu0 %1280 }
 0x267   : > { %v1361_v60 = vadd.f32 %v2703_v57, %v1281_v59 }
 0x269   : > { %1394 = vst.msk [vmem:[%s2706_s25 + $0x40] sm:$0xff] %vm1385_vm1, %v1361_v60 }
 0x26a   : > { %v1284_v61 = vpop.xlane.xlu1 %1283 }
 0x26b   : > { %v1362_v62 = vadd.f32 %v2703_v57, %v1284_v61 }
 0x26d   : > { %1395 = vst.msk [vmem:[%s2706_s25 + $0x48] sm:$0xff] %vm1385_vm1, %v1362_v62 }
 0x26e   : > { %v1287_v2 = vpop.xlane.xlu0 %1286 }
 0x26f   : > { %v1363_v3 = vadd.f32 %v2703_v57, %v1287_v2 }
 0x271   : > { %1396 = vst.msk [vmem:[%s2706_s25 + $0x50] sm:$0xff] %vm1385_vm1, %v1363_v3 }
 0x272   : > { %v1290_v4 = vpop.xlane.xlu1 %1289 }
 0x273   : > { %v1364_v5 = vadd.f32 %v2703_v57, %v1290_v4 }
 0x275   : > { %1397 = vst.msk [vmem:[%s2706_s25 + $0x58] sm:$0xff] %vm1385_vm1, %v1364_v5 }
 0x276   : > { %v1293_v6 = vpop.xlane.xlu0 %1292 }
 0x277   : > { %v1365_v7 = vadd.f32 %v2703_v57, %v1293_v6 }
 0x279   : > { %1398 = vst.msk [vmem:[%s2706_s25 + $0x60] sm:$0xff] %vm1385_vm1, %v1365_v7 }
 0x27a   : > { %v1296_v8 = vpop.xlane.xlu1 %1295 }
 0x27b   : > { %v1366_v9 = vadd.f32 %v2703_v57, %v1296_v8 }
 0x27d   : > { %1399 = vst.msk [vmem:[%s2706_s25 + $0x68] sm:$0xff] %vm1385_vm1, %v1366_v9 }
 0x27e   : > { %v1299_v10 = vpop.xlane.xlu0 %1298 }
 0x27f   : > { %v1367_v11 = vadd.f32 %v2703_v57, %v1299_v10 }
 0x281   : > { %1400 = vst.msk [vmem:[%s2706_s25 + $0x70] sm:$0xff] %vm1385_vm1, %v1367_v11 }
 0x282   : > { %v1302_v40 = vpop.xlane.xlu1 %1301 }
 0x283   : > { %v1368_v12 = vadd.f32 %v2703_v57, %v1302_v40 }
 0x285   : > { %1401 = vst.msk [vmem:[%s2706_s25 + $0x78] sm:$0xff] %vm1385_vm1, %v1368_v12 }
 0x286   : > { %v1305_v13 = vpop.xlane.xlu0 %1304 }
 0x287   : > { %v1369_v42 = vadd.f32 %v2703_v57, %v1305_v13 }
 0x289   : > { %1402 = vst.msk [vmem:[%s2706_s25 + $0x80] sm:$0xff] %vm1385_vm1, %v1369_v42 }
 0x28a   : > { %v1308_v14 = vpop.xlane.xlu1 %1307 }
 0x28b   : > { %v1370_v15 = vadd.f32 %v2703_v57, %v1308_v14 }
 0x28d   : > { %1403 = vst.msk [vmem:[%s2706_s25 + $0x88] sm:$0xff] %vm1385_vm1, %v1370_v15 }
 0x28e   : > { %v1311_v16 = vpop.xlane.xlu0 %1310 }
 0x28f   : > { %v1371_v17 = vadd.f32 %v2703_v57, %v1311_v16 }
 0x291   : > { %1404 = vst.msk [vmem:[%s2706_s25 + $0x90] sm:$0xff] %vm1385_vm1, %v1371_v17 }
 0x292   : > { %v1314_v18 = vpop.xlane.xlu1 %1313 }
 0x293   : > { %v1372_v19 = vadd.f32 %v2703_v57, %v1314_v18 }
 0x295   : > { %1405 = vst.msk [vmem:[%s2706_s25 + $0x98] sm:$0xff] %vm1385_vm1, %v1372_v19 }
 0x296   : > { %v1317_v20 = vpop.xlane.xlu0 %1316 }
 0x297   : > { %v1373_v21 = vadd.f32 %v2703_v57, %v1317_v20 }
 0x299   : > { %1406 = vst.msk [vmem:[%s2706_s25 + $0xa0] sm:$0xff] %vm1385_vm1, %v1373_v21 }
 0x29a   : > { %v1320_v22 = vpop.xlane.xlu1 %1319 }
 0x29b   : > { %v1374_v23 = vadd.f32 %v2703_v57, %v1320_v22 }
 0x29d   : > { %1407 = vst.msk [vmem:[%s2706_s25 + $0xa8] sm:$0xff] %vm1385_vm1, %v1374_v23 }
 0x29e   : > { %v1323_v24 = vpop.xlane.xlu0 %1322 }
 0x29f   : > { %v1375_v25 = vadd.f32 %v2703_v57, %v1323_v24 }
 0x2a1   : > { %1408 = vst.msk [vmem:[%s2706_s25 + $0xb0] sm:$0xff] %vm1385_vm1, %v1375_v25 }
 0x2a2   : > { %v1326_v26 = vpop.xlane.xlu1 %1325 }
 0x2a3   : > { %v1376_v27 = vadd.f32 %v2703_v57, %v1326_v26 }
 0x2a5   : > { %1409 = vst.msk [vmem:[%s2706_s25 + $0xb8] sm:$0xff] %vm1385_vm1, %v1376_v27 }
 0x2a6   : > { %v1329_v28 = vpop.xlane.xlu0 %1328 }
 0x2a7   : > { %v1377_v29 = vadd.f32 %v2703_v57, %v1329_v28 }
 0x2a9   : > { %1410 = vst.msk [vmem:[%s2706_s25 + $0xc0] sm:$0xff] %vm1385_vm1, %v1377_v29 }
 0x2aa   : > { %v1332_v30 = vpop.xlane.xlu1 %1331 }
 0x2ab   : > { %v1378_v31 = vadd.f32 %v2703_v57, %v1332_v30 }
 0x2ad   : > { %1411 = vst.msk [vmem:[%s2706_s25 + $0xc8] sm:$0xff] %vm1385_vm1, %v1378_v31 }
 0x2ae   : > { %v1335_v32 = vpop.xlane.xlu0 %1334 }
 0x2af   : > { %v1379_v33 = vadd.f32 %v2703_v57, %v1335_v32 }
 0x2b1   : > { %1412 = vst.msk [vmem:[%s2706_s25 + $0xd0] sm:$0xff] %vm1385_vm1, %v1379_v33 }
 0x2b2   : > { %v1338_v34 = vpop.xlane.xlu1 %1337 }
 0x2b3   : > { %v1380_v35 = vadd.f32 %v2703_v57, %v1338_v34 }
 0x2b5   : > { %1413 = vst.msk [vmem:[%s2706_s25 + $0xd8] sm:$0xff] %vm1385_vm1, %v1380_v35 }
 0x2b6   : > { %v1341_v36 = vpop.xlane.xlu0 %1340 }
 0x2b7   : > { %v1381_v37 = vadd.f32 %v2703_v57, %v1341_v36 }
 0x2b9   : > { %1414 = vst.msk [vmem:[%s2706_s25 + $0xe0] sm:$0xff] %vm1385_vm1, %v1381_v37 }
 0x2ba   : > { %v1344_v38 = vpop.xlane.xlu1 %1343 }
 0x2bb   : > { %v1382_v39 = vadd.f32 %v2703_v57, %v1344_v38 }
 0x2bd   : > { %1415 = vst.msk [vmem:[%s2706_s25 + $0xe8] sm:$0xff] %vm1385_vm1, %v1382_v39 }
 0x2be   : > { %v1347_v41 = vpop.xlane.xlu0 %1346 }
 0x2bf   : > { %v1383_v0 = vadd.f32 %v2703_v57, %v1347_v41 }
 0x2c1   : > { %1416 = vst.msk [vmem:[%s2706_s25 + $0xf0] sm:$0xff] %vm1385_vm1, %v1383_v0  ;;  %1424 = sbr.rel (!%p2187_p4) target bundleno = 758 (0x2f6), region = 56 }
 0x2c2   : > { %v1350_v45 = vpop.xlane.xlu1 %1349 }
 0x2c3   : > { %v1384_v46 = vadd.f32 %v2703_v57, %v1350_v45 }
 0x2c5   : > { %1417 = vst.msk [vmem:[%s2706_s25 + $0xf8] sm:$0xff] %vm1385_vm1, %v1384_v46 }
 0x2c6   : > { %s2961_s26 = smov (!%p1427_p6, %s1426_s26), 32 }
 0x2c7   : > { %s1813_s12 = sshll.u32 %s2961_s26, 7 }
 0x2c8   : > { %p1816_p7 = scmp.eq.s32.totalorder %s1813_s12, 0 }
 0x2c9   : > { %s2816_s13 = sshrl.u32 (!%p1816_p7), %s2961_s26, 5 }
 0x2ca   : > { %1435 = sbr.rel (%p1816_p7) target bundleno = 758 (0x2f6), region = 60  ;;  %p1817_p4 = scmp.le.s32.totalorder (!%p1816_p7), %s2816_s13, 0 }
 0x2cf   : > { %1717 = sbr.rel (%p1817_p4) target bundleno = 741 (0x2e5), region = 137  ;;  %s2952_s6 = smov (!%p1817_p4), %s2810_s11 }
 0x2d0   : > { %s2953_s10 = smov (!%p1817_p4), %s2706_s25  ;;  %s2825_s19 = smov (!%p1817_p4), 0  }
 0x2d1   : > { %s2827_s14 = smov (!%p1817_p4), 0  }
 0x2d4 LB: >> { %v1560_v57 = vld [vmem:[%s2089_s10] sm:$0xff]  ;;  %v1562_v47 = vld [vmem:[%s2089_s10 + $0x8] sm:$0xff]  ;;  %v1564_v58 = vld [vmem:[%s2089_s10 + $0x10] sm:$0xff]  ;;  %s1624_s15 = sadd.s32 1, %s2093_s19  ;;  %s1554_s14 = sadd.s32 1, %s2097_s14   ;;  %s2097_s14 = sphi %s2827_s14, %s1554_s14   ;;  %s2093_s19 = sphi %s2825_s19, %s2956_s19   ;;  %s2089_s10 = sphi %s2953_s10, %s2955_s10   ;;  %s2085_s6 = sphi %s2952_s6, %s2954_s6  }
 0x2d5   : >> { %1561 = vst [vmem:[%s2085_s6] sm:$0xff] %v1560_v57  ;;  %1563 = vst [vmem:[%s2085_s6 + $0x8] sm:$0xff] %v1562_v47  ;;  %v1566_v63 = vld [vmem:[%s2089_s10 + $0x18] sm:$0xff]  ;;  %v1568_v1 = vld [vmem:[%s2089_s10 + $0x20] sm:$0xff]  ;;  %p1625_p8 = scmp.ge.s32.totalorder %s1624_s15, %s2816_s13  ;;  %p1553_p9 = scmp.ge.s32.totalorder %s1554_s14, %s2816_s13 }
 0x2d6   : >> { %1565 = vst [vmem:[%s2085_s6 + $0x10] sm:$0xff] %v1564_v58  ;;  %v1570_v48 = vld [vmem:[%s2089_s10 + $0x28] sm:$0xff]  ;;  %1567 = vst [vmem:[%s2085_s6 + $0x18] sm:$0xff] %v1566_v63  ;;  %v1572_v49 = vld [vmem:[%s2089_s10 + $0x30] sm:$0xff] }
 0x2d7   : >> { %1569 = vst [vmem:[%s2085_s6 + $0x20] sm:$0xff] %v1568_v1  ;;  %1571 = vst [vmem:[%s2085_s6 + $0x28] sm:$0xff] %v1570_v48  ;;  %v1574_v50 = vld [vmem:[%s2089_s10 + $0x38] sm:$0xff]  ;;  %v1576_v51 = vld [vmem:[%s2089_s10 + $0x40] sm:$0xff]  ;;  %s2963_s15 = smov (%p1625_p8, %s1624_s15), 0 }
 0x2d8   : >> { %1573 = vst [vmem:[%s2085_s6 + $0x30] sm:$0xff] %v1572_v49  ;;  %1575 = vst [vmem:[%s2085_s6 + $0x38] sm:$0xff] %v1574_v50  ;;  %v1578_v52 = vld [vmem:[%s2089_s10 + $0x48] sm:$0xff]  ;;  %v1580_v53 = vld [vmem:[%s2089_s10 + $0x50] sm:$0xff]  ;;  %s1818_s16 = sshll.u32 %s2963_s15, 8  ;;  %s2956_s19 = smov %s2963_s15 }
 0x2d9   : >> { %1577 = vst [vmem:[%s2085_s6 + $0x40] sm:$0xff] %v1576_v51  ;;  %v1582_v54 = vld [vmem:[%s2089_s10 + $0x58] sm:$0xff]  ;;  %1579 = vst [vmem:[%s2085_s6 + $0x48] sm:$0xff] %v1578_v52  ;;  %v1584_v55 = vld [vmem:[%s2089_s10 + $0x60] sm:$0xff]  ;;  %s2883_s17 = scalar_lea.vmem %s2706_s25, %s1818_s16 [#allocation5]   ;;  %s1630_s18 = scalar_lea.vmem %s2810_s11, %s1818_s16  }
 0x2da   : >> { %1581 = vst [vmem:[%s2085_s6 + $0x50] sm:$0xff] %v1580_v53  ;;  %1583 = vst [vmem:[%s2085_s6 + $0x58] sm:$0xff] %v1582_v54  ;;  %v1586_v56 = vld [vmem:[%s2089_s10 + $0x68] sm:$0xff]  ;;  %v1588_v43 = vld [vmem:[%s2089_s10 + $0x70] sm:$0xff] }
 0x2db   : >> { %1585 = vst [vmem:[%s2085_s6 + $0x60] sm:$0xff] %v1584_v55  ;;  %1587 = vst [vmem:[%s2085_s6 + $0x68] sm:$0xff] %v1586_v56  ;;  %v1590_v44 = vld [vmem:[%s2089_s10 + $0x78] sm:$0xff]  ;;  %v1592_v59 = vld [vmem:[%s2089_s10 + $0x80] sm:$0xff] }
 0x2dc   : >> { %1589 = vst [vmem:[%s2085_s6 + $0x70] sm:$0xff] %v1588_v43  ;;  %v1594_v60 = vld [vmem:[%s2089_s10 + $0x88] sm:$0xff]  ;;  %1591 = vst [vmem:[%s2085_s6 + $0x78] sm:$0xff] %v1590_v44  ;;  %v1596_v61 = vld [vmem:[%s2089_s10 + $0x90] sm:$0xff] }
 0x2dd   : >> { %1593 = vst [vmem:[%s2085_s6 + $0x80] sm:$0xff] %v1592_v59  ;;  %1595 = vst [vmem:[%s2085_s6 + $0x88] sm:$0xff] %v1594_v60  ;;  %v1598_v62 = vld [vmem:[%s2089_s10 + $0x98] sm:$0xff]  ;;  %v1600_v2 = vld [vmem:[%s2089_s10 + $0xa0] sm:$0xff] }
 0x2de   : >> { %1597 = vst [vmem:[%s2085_s6 + $0x90] sm:$0xff] %v1596_v61  ;;  %1599 = vst [vmem:[%s2085_s6 + $0x98] sm:$0xff] %v1598_v62  ;;  %v1602_v3 = vld [vmem:[%s2089_s10 + $0xa8] sm:$0xff]  ;;  %v1604_v4 = vld [vmem:[%s2089_s10 + $0xb0] sm:$0xff] }
 0x2df   : >> { %1601 = vst [vmem:[%s2085_s6 + $0xa0] sm:$0xff] %v1600_v2  ;;  %v1606_v5 = vld [vmem:[%s2089_s10 + $0xb8] sm:$0xff]  ;;  %1603 = vst [vmem:[%s2085_s6 + $0xa8] sm:$0xff] %v1602_v3  ;;  %v1608_v6 = vld [vmem:[%s2089_s10 + $0xc0] sm:$0xff] }
 0x2e0   : >> { %1605 = vst [vmem:[%s2085_s6 + $0xb0] sm:$0xff] %v1604_v4  ;;  %1607 = vst [vmem:[%s2085_s6 + $0xb8] sm:$0xff] %v1606_v5  ;;  %v1610_v7 = vld [vmem:[%s2089_s10 + $0xc8] sm:$0xff]  ;;  %v1612_v8 = vld [vmem:[%s2089_s10 + $0xd0] sm:$0xff]  ;;  %1556 = sbr.rel (!%p1553_p9) target bundleno = 724 (0x2d4), region = 143 }
 0x2e1   : >> { %1609 = vst [vmem:[%s2085_s6 + $0xc0] sm:$0xff] %v1608_v6  ;;  %1611 = vst [vmem:[%s2085_s6 + $0xc8] sm:$0xff] %v1610_v7  ;;  %v1614_v9 = vld [vmem:[%s2089_s10 + $0xd8] sm:$0xff]  ;;  %v1616_v10 = vld [vmem:[%s2089_s10 + $0xe0] sm:$0xff] }
 0x2e2   : >> { %1613 = vst [vmem:[%s2085_s6 + $0xd0] sm:$0xff] %v1612_v8  ;;  %v1618_v11 = vld [vmem:[%s2089_s10 + $0xe8] sm:$0xff]  ;;  %1615 = vst [vmem:[%s2085_s6 + $0xd8] sm:$0xff] %v1614_v9  ;;  %v1620_v40 = vld [vmem:[%s2089_s10 + $0xf0] sm:$0xff] }
 0x2e3   : >> { %1617 = vst [vmem:[%s2085_s6 + $0xe0] sm:$0xff] %v1616_v10  ;;  %1619 = vst [vmem:[%s2085_s6 + $0xe8] sm:$0xff] %v1618_v11  ;;  %v1622_v12 = vld [vmem:[%s2089_s10 + $0xf8] sm:$0xff]  ;;  %s2955_s10 = smov %s2883_s17 }
 0x2e4   : >> { %1621 = vst [vmem:[%s2085_s6 + $0xf0] sm:$0xff] %v1620_v40  ;;  %1623 = vst [vmem:[%s2085_s6 + $0xf8] sm:$0xff] %v1622_v12  ;;  %s2954_s6 = smov %s1630_s18 }
 0x2e5 PF: > { %s2924_s20 = sand.u32 31, %s2961_s26   ;;  %s1829_s21 = sshll.u32 %s2816_s13, 8 }
 0x2e6   : > { %s1635_s22 = scalar_lea.vmem %s2706_s25, %s1829_s21 [#allocation5]   ;;  %s1637_s23 = scalar_lea.vmem %s2810_s11, %s1829_s21  }
 0x2e7   : > { %p1823_p10 = scmp.le.s32.totalorder %s2924_s20, 0 }
 0x2e8   : > { %s2099_s24 = smov (!%p1823_p10), %s1637_s23   ;;  %s2103_s28 = smov (!%p1823_p10), %s1635_s22  }
 0x2e9   : > { %1731 = sbr.rel (%p1823_p10) target bundleno = 758 (0x2f6), region = 148  ;;  %s2107_s30 = smov (!%p1823_p10), 0  }
 0x2ea   : > { %s2111_s8 = smov (!%p1823_p10), 0  }
 0x2ee LB: >> { %v1647_v13 = vld [vmem:[%s2105_s28] sm:$0xff]  ;;  %s1649_s26 = sadd.s32 1, %s2109_s30  ;;  %s1641_s8 = sadd.s32 1, %s2113_s8   ;;  %s2113_s8 = sphi %s2111_s8, %s1641_s8   ;;  %s2109_s30 = sphi %s2107_s30, %s2108_s30   ;;  %s2105_s28 = sphi %s2103_s28, %s1654_s28   ;;  %s2101_s24 = sphi %s2099_s24, %s1655_s24  }
 0x2ef   : >> { %1648 = vst [vmem:[%s2101_s24] sm:$0xff] %v1647_v13  ;;  %p1650_p11 = scmp.ge.s32.totalorder %s1649_s26, %s2924_s20  ;;  %p1640_p12 = scmp.ge.s32.totalorder %s1641_s8, %s2924_s20 }
 0x2f1   : >> { %s2965_s26 = smov (%p1650_p11, %s1649_s26), 0  ;;  %1643 = sbr.rel (!%p1640_p12) target bundleno = 750 (0x2ee), region = 154 }
 0x2f2   : >> { %s1824_s25 = sshll.u32 %s2965_s26, 3  ;;  %s2108_s30 = smov %s2965_s26  }
 0x2f3   : >> { %s1654_s28 = scalar_lea.vmem %s1635_s22, %s1824_s25 [#allocation5]   ;;  %s1655_s24 = scalar_lea.vmem %s1637_s23, %s1824_s25  }
 0x2f6 PF: > { %p16_p13 = scmp.ge.s32.totalorder %s2177_s29, 4   ;;  %s2957_s26 = smov %s2077_s27 }
 0x2f7   : > { %s2958_s27 = smov %s2185_s9  ;;  %s2959_s28 = smov %s2177_s29 }
 0x2f8   :  { %18 = sbr.rel (!%p16_p13) target bundleno = 4 (0x4), region = 165 }
 0x2fd   :  { %1671 = vsyncpa [#allocation4], 1 }
 0x2fe   :  { %1673 = vsyncpa [#allocation4 + $0x1], 1 }

</bundles_post_ra>
